<compile_context>
chip_gen: v6e
topology: v6e:2x2x1
jax: 0.10.0
libtpu: 0.0.40
codegen_flags: <defaults>
</compile_context>

<pallas_src>
import functools
import numpy as np

import jax
import jax.numpy as jnp
from jax.experimental import pallas as pl
from jax.experimental.pallas import tpu as pltpu


def _round_up(v, m):
    return ((v + m - 1) // m) * m


# -----------------------------------------------------------------------------
# Kernel 1: per-branch boundary message passing.
#   grid = (2 branches ["parallel"], E tiles ["arbitrary"])
#   out  = [N_pad, 2*slab_p] f32, slab_p = Hp + Dp; branch b owns lanes
#          [b*slab_p : (b+1)*slab_p] = [ segsum(m_e) | segsum(x_ij * scale) ]
# -----------------------------------------------------------------------------
def _edge_kernel(counts_ref, feat_ref, bi_ref,
                 W1ab_ref, w1x_ref, b1_ref, W2_ref, b2_ref,
                 cW1_ref, cb1_ref, cW2_ref, cb2_ref,
                 out_ref):
    f32 = jnp.float32
    b = pl.program_id(0)
    e = pl.program_id(1)
    tE = feat_ref.shape[0]
    Ap = W1ab_ref.shape[0]
    n_pad = out_ref.shape[0]

    @pl.when(e == 0)
    def _():
        out_ref[...] = jnp.zeros_like(out_ref)

    # skip edge tiles that are entirely padding for this branch
    @pl.when(e * tE < counts_ref[b])
    def _():
        feat = feat_ref[...]                      # [tE, Ap + Dp], f32
        hfeat = feat[:, :Ap]                      # [h_i | h_j | 0 ...]
        x_ij = feat[:, Ap:]                       # x_i - x_j, zero padded to Dp

        x_msg = jnp.sum(x_ij * x_ij, axis=-1, keepdims=True)        # [tE, 1]

        # boundary MLP first layer without any lane concat:
        #   z1 = [h_i | h_j] @ W1ab + x_msg * w1x + b1
        z1 = (jnp.dot(hfeat, W1ab_ref[...], preferred_element_type=f32)
              + x_msg * w1x_ref[...] + b1_ref[...])
        # Dropout == identity (eval), ReLU, second Linear; W2/b2 are padded
        # to Hp columns so m_e is born 128-lane wide (full-lane everywhere).
        m_e = (jnp.dot(jnp.maximum(z1, 0.0), W2_ref[...],
                       preferred_element_type=f32) + b2_ref[...])    # [tE, Hp]

        # coord MLP: Linear -> ReLU -> Linear -> Sigmoid (cW1 zero-row padded)
        s1 = jnp.maximum(
            jnp.dot(m_e, cW1_ref[...], preferred_element_type=f32)
            + cb1_ref[...], 0.0)
        scale = jax.nn.sigmoid(
            jnp.dot(s1, cW2_ref[...], preferred_element_type=f32)
            + cb2_ref[...])                                          # [tE, 1]
        xs = x_ij * scale                                            # [tE, Dp]

        # scatter (unsorted_segment_sum): one-hot built directly in
        # [N_pad, tE] orientation, plain jnp.dot -> no LHS transpose.
        rows = jax.lax.broadcasted_iota(jnp.int32, (n_pad, tE), 0)
        giT = (rows == bi_ref[...]).astype(f32)                      # [N_pad, tE]

        # concat at a 128-aligned offset (Hp), then one scatter matmul and a
        # full-lane read-modify-write of the resident accumulator block.
        payload = jnp.concatenate([m_e, xs], axis=-1)                # [tE, slab_p]
        out_ref[...] = out_ref[...] + jnp.dot(
            giT, payload, preferred_element_type=f32)


# -----------------------------------------------------------------------------
# Kernel 2: cell / coordinate update (grid over cell tiles, "parallel")
# -----------------------------------------------------------------------------
def _cell_kernel(cw_ref, cin_ref, agg_ref,
                 W1h_ref, W1m_ref, W1d_ref, b1_ref, W2_ref, b2_ref,
                 out_ref):
    f32 = jnp.float32
    Fp = W1h_ref.shape[0]
    Hp = W1m_ref.shape[0]

    cin = cin_ref[...]                    # [tN, Fp + Dp] = [h_pad | x_pad]
    h_p = cin[:, :Fp]
    x_p = cin[:, Fp:]
    Dp = x_p.shape[1]
    slab_p = Hp + Dp

    agg = agg_ref[...]                    # [tN, 2*slab_p] straight from kernel 1
    m_up = agg[:, :Hp]
    xs_up = agg[:, Hp:slab_p]
    m_dn = agg[:, slab_p:slab_p + Hp]
    xs_dn = agg[:, slab_p + Hp:]

    # cell MLP first layer fused as three matmuls (no lane concat),
    # Dropout == identity, ReLU, second Linear (zero-padded to Op columns),
    # residual add (output_nf == input_nf asserted in the wrapper).
    z1 = (jnp.dot(h_p, W1h_ref[...], preferred_element_type=f32)
          + jnp.dot(m_up, W1m_ref[...], preferred_element_type=f32)
          + jnp.dot(m_dn, W1d_ref[...], preferred_element_type=f32)
          + b1_ref[...])
    h_upd = (jnp.dot(jnp.maximum(z1, 0.0), W2_ref[...],
                     preferred_element_type=f32) + b2_ref[...])      # [tN, Op]
    h_new = h_p + h_upd

    # coordinate update, coord_weights read as SMEM scalars
    x_new = x_p + cw_ref[0] * xs_up + cw_ref[1] * xs_dn              # [tN, Dp]

    out_ref[...] = jnp.concatenate([h_new, x_new], axis=-1)   # 128-aligned concat


# -----------------------------------------------------------------------------
# Wrapper
# -----------------------------------------------------------------------------
def ehon_mpl_boundary_forward(params, h, h_up, h_down, x, x_up, x_down,
                              b_up, b_down, *, edge_tile=512, cell_tile=512):
    f32 = jnp.float32

    N, F = h.shape
    _, Fu = h_up.shape
    _, Fd = h_down.shape
    D = x.shape[1]
    H = params["up_b1"].shape[1]
    O = params["cell_b2"].shape[1]
    assert O == F, "residual cell update requires output_nf == input_nf"

    b_up_i, b_up_j = b_up
    b_down_j, b_down_i = b_down      # same unpacking order as the PyTorch forward

    # lane-padded widths (multiples of 128)
    Fo = max(Fu, Fd)
    Ap = _round_up(F + Fo, 128)      # [h_i | h_j] slice of the edge features
    Dp = _round_up(D, 128)
    Hp = _round_up(H, 128)
    Fp = _round_up(F, 128)
    Op = _round_up(O, 128)
    slab_p = Hp + Dp                 # per-branch output slab of the edge kernel
    P = Ap + Dp

    # ---- tiling ----
    Eu = int(b_up_i.shape[0])
    Ed = int(b_down_i.shape[0])
    E_max = max(Eu, Ed, 1)
    tE = min(edge_tile, _round_up(E_max, 128))
    E_pad = _round_up(E_max, tE)
    n_e_tiles = E_pad // tE

    tN = min(cell_tile, _round_up(N, 8))
    N_pad = _round_up(N, tN)

    # ---- per-edge gathered features (XLA row gathers; coordinates stay f32
    #      so x_i - x_j is exact; no gather one-hots inside the kernel) ----
    def gather_feat(h_other, x_other, bi, bj, Fo_b):
        E = bi.shape[0]
        hh = jnp.concatenate(
            [jnp.take(h, bi, axis=0), jnp.take(h_other, bj, axis=0)],
            axis=-1).astype(f32)                                     # [E, F+Fo_b]
        x_ij = (jnp.take(x, bi, axis=0)
                - jnp.take(x_other, bj, axis=0)).astype(f32)         # [E, D]
        hh = jnp.pad(hh, ((0, E_pad - E), (0, Ap - (F + Fo_b))))
        xx = jnp.pad(x_ij, ((0, E_pad - E), (0, Dp - D)))
        return jnp.concatenate([hh, xx], axis=-1)                    # [E_pad, P]

    feat = jnp.stack([gather_feat(h_up, x_up, b_up_i, b_up_j, Fu),
                      gather_feat(h_down, x_down, b_down_i, b_down_j, Fd)])

    def pad_bi(idx):
        idx = idx.astype(jnp.int32)
        # padded edges point at row N: either a discarded padded row
        # (N_pad > N) or out of range (all-zero one-hot column).
        return jnp.pad(idx, (0, E_pad - idx.shape[0]), constant_values=N)

    bi_all = jnp.stack([pad_bi(b_up_i), pad_bi(b_down_i)]).reshape(2, 1, E_pad)
    counts = jnp.array([Eu, Ed], dtype=jnp.int32)

    # ---- per-branch weights, pre-packed / zero-padded once in the wrapper ----
    def pack_branch(W1, b1, W2, b2, cW1, cb1, cW2, cb2, Fo_b):
        Wab = jnp.pad(W1[:F + Fo_b], ((0, Ap - (F + Fo_b)), (0, 0)))  # [Ap, H]
        w1x = W1[F + Fo_b:F + Fo_b + 1]                               # [1, H]
        W2p = jnp.pad(W2, ((0, 0), (0, Hp - H)))                      # [H, Hp]
        b2p = jnp.pad(b2, ((0, 0), (0, Hp - H)))                      # [1, Hp]
        cW1p = jnp.pad(cW1, ((0, Hp - H), (0, 0)))                    # [Hp, H]
        return Wab, w1x, b1, W2p, b2p, cW1p, cb1, cW2, cb2

    up = pack_branch(params["up_W1"], params["up_b1"],
                     params["up_W2"], params["up_b2"],
                     params["cu_W1"], params["cu_b1"],
                     params["cu_W2"], params["cu_b2"], Fu)
    dn = pack_branch(params["dn_W1"], params["dn_b1"],
                     params["dn_W2"], params["dn_b2"],
                     params["cd_W1"], params["cd_b1"],
                     params["cd_W2"], params["cd_b2"], Fd)
    (W1ab_s, w1x_s, b1_s, W2_s, b2_s,
     cW1_s, cb1_s, cW2_s, cb2_s) = [jnp.stack(t) for t in zip(up, dn)]

    # ---- VMEM limit: generation aware, ~25% headroom ----
    try:
        vmem_cap = pltpu.get_tpu_info().vmem_capacity_bytes
    except Exception:
        vmem_cap = 128 * 2**20
    vmem_limit = int(vmem_cap * 3 // 4)

    cost = pl.CostEstimate(
        flops=int(2 * (2 * E_pad * (Ap * H + 2 * H * Hp + Hp * H + H)
                       + 2 * N_pad * E_pad * slab_p)),
        transcendentals=int(2 * 2 * E_pad),
        bytes_accessed=int(4 * (feat.size + bi_all.size
                                + N_pad * 2 * slab_p + 2 * Ap * H)))

    # ---- kernel 1 ----
    edge_fn = pl.pallas_call(
        _edge_kernel,
        grid_spec=pltpu.PrefetchScalarGridSpec(
            num_scalar_prefetch=1,
            grid=(2, n_e_tiles),
            in_specs=[
                pl.BlockSpec((None, tE, P), lambda b, e, c: (b, e, 0)),
                pl.BlockSpec((None, 1, tE), lambda b, e, c: (b, 0, e)),
                pl.BlockSpec((None, Ap, H), lambda b, e, c: (b, 0, 0)),
                pl.BlockSpec((None, 1, H), lambda b, e, c: (b, 0, 0)),
                pl.BlockSpec((None, 1, H), lambda b, e, c: (b, 0, 0)),
                pl.BlockSpec((None, H, Hp), lambda b, e, c: (b, 0, 0)),
                pl.BlockSpec((None, 1, Hp), lambda b, e, c: (b, 0, 0)),
                pl.BlockSpec((None, Hp, H), lambda b, e, c: (b, 0, 0)),
                pl.BlockSpec((None, 1, H), lambda b, e, c: (b, 0, 0)),
                pl.BlockSpec((None, H, 1), lambda b, e, c: (b, 0, 0)),
                pl.BlockSpec((None, 1, 1), lambda b, e, c: (b, 0, 0)),
            ],
            out_specs=pl.BlockSpec((N_pad, slab_p), lambda b, e, c: (0, b)),
        ),
        out_shape=jax.ShapeDtypeStruct((N_pad, 2 * slab_p), f32),
        compiler_params=pltpu.CompilerParams(
            dimension_semantics=("parallel", "arbitrary"),
            vmem_limit_bytes=vmem_limit),
        cost_estimate=cost,
    )
    agg = edge_fn(counts, feat, bi_all, W1ab_s, w1x_s, b1_s, W2_s, b2_s,
                  cW1_s, cb1_s, cW2_s, cb2_s)

    # ---- kernel 2 (consumes agg directly -- no transpose / relayout) ----
    cell_in = jnp.concatenate(
        [jnp.pad(h.astype(f32), ((0, N_pad - N), (0, Fp - F))),
         jnp.pad(x.astype(f32), ((0, N_pad - N), (0, Dp - D)))], axis=-1)

    W1h = jnp.pad(params["cell_W1"][:F], ((0, Fp - F), (0, 0)))
    W1m = jnp.pad(params["cell_W1"][F:F + H], ((0, Hp - H), (0, 0)))
    W1d = jnp.pad(params["cell_W1"][F + H:F + 2 * H], ((0, Hp - H), (0, 0)))
    cW2p = jnp.pad(params["cell_W2"], ((0, 0), (0, Op - O)))
    cb2p = jnp.pad(params["cell_b2"], ((0, 0), (0, Op - O)))
    cw = params["cw"].reshape(-1).astype(f32)

    cell_fn = pl.pallas_call(
        _cell_kernel,
        grid=(N_pad // tN,),
        in_specs=[
            pl.BlockSpec(memory_space=pltpu.MemorySpace.SMEM),
            pl.BlockSpec((tN, Fp + Dp), lambda i: (i, 0)),
            pl.BlockSpec((tN, 2 * slab_p), lambda i: (i, 0)),
            pl.BlockSpec((Fp, H), lambda i: (0, 0)),
            pl.BlockSpec((Hp, H), lambda i: (0, 0)),
            pl.BlockSpec((Hp, H), lambda i: (0, 0)),
            pl.BlockSpec((1, H), lambda i: (0, 0)),
            pl.BlockSpec((H, Op), lambda i: (0, 0)),
            pl.BlockSpec((1, Op), lambda i: (0, 0)),
        ],
        out_specs=pl.BlockSpec((tN, Op + Dp), lambda i: (i, 0)),
        out_shape=jax.ShapeDtypeStruct((N_pad, Op + Dp), f32),
        compiler_params=pltpu.CompilerParams(
            dimension_semantics=("parallel",)),
    )
    out = cell_fn(cw, cell_in, agg, W1h, W1m, W1d,
                  params["cell_b1"], cW2p, cb2p)

    return out[:N, :O], out[:N, Op:Op + D]


# -----------------------------------------------------------------------------
# Pure-JAX reference (mirrors the PyTorch forward, dropout = identity, f32)
# -----------------------------------------------------------------------------
def reference_forward(params, h, h_up, h_down, x, x_up, x_down, b_up, b_down):
    def mlp(z, W1, b1, W2, b2):
        return jnp.maximum(z @ W1 + b1, 0.0) @ W2 + b2

    def seg_sum(data, idx, n):
        return jnp.zeros((n,) + data.shape[1:], data.dtype).at[idx].add(data)

    b_up_i, b_up_j = b_up
    b_down_j, b_down_i = b_down
    N = h.shape[0]

    # up
    h_i, h_j = h[b_up_i], h_up[b_up_j]
    x_i, x_j = x[b_up_i], x_up[b_up_j]
    x_msg = jnp.sum((x_i - x_j) ** 2, -1, keepdims=True)
    m_up_e = mlp(jnp.concatenate([h_i, h_j, x_msg], -1),
                 params["up_W1"], params["up_b1"], params["up_W2"], params["up_b2"])
    m_up = seg_sum(m_up_e, b_up_i, N)
    scale = jax.nn.sigmoid(mlp(m_up_e, params["cu_W1"], params["cu_b1"],
                               params["cu_W2"], params["cu_b2"]))
    x_up_out = params["cw"][0, 0] * seg_sum((x_i - x_j) * scale, b_up_i, N)

    # down
    h_i, h_j = h[b_down_i], h_down[b_down_j]
    x_i, x_j = x[b_down_i], x_down[b_down_j]
    x_msg = jnp.sum((x_i - x_j) ** 2, -1, keepdims=True)
    m_dn_e = mlp(jnp.concatenate([h_i, h_j, x_msg], -1),
                 params["dn_W1"], params["dn_b1"], params["dn_W2"], params["dn_b2"])
    m_dn = seg_sum(m_dn_e, b_down_i, N)
    scale = jax.nn.sigmoid(mlp(m_dn_e, params["cd_W1"], params["cd_b1"],
                               params["cd_W2"], params["cd_b2"]))
    x_dn_out = params["cw"][0, 1] * seg_sum((x_i - x_j) * scale, b_down_i, N)

    m = jnp.concatenate([m_up, m_dn], -1)
    h_upd = mlp(jnp.concatenate([h, m], -1),
                params["cell_W1"], params["cell_b1"],
                params["cell_W2"], params["cell_b2"])
    return h + h_upd, x + x_up_out + x_dn_out


# -----------------------------------------------------------------------------
# Deterministic parameter init (PyTorch Linear-style uniform)
# -----------------------------------------------------------------------------
def init_params(key, F, Fu, Fd, H, O):
    keys = iter(jax.random.split(key, 32))

    def linear(fan_in, fan_out):
        bound = 1.0 / float(np.sqrt(fan_in))
        W = jax.random.uniform(next(keys), (fan_in, fan_out), jnp.float32,
                               -bound, bound)
        b = jax.random.uniform(next(keys), (1, fan_out), jnp.float32,
                               -bound, bound)
        return W, b

    p = {}
    p["up_W1"], p["up_b1"] = linear(F + Fu + 1, H)
    p["up_W2"], p["up_b2"] = linear(H, H)
    p["dn_W1"], p["dn_b1"] = linear(F + Fd + 1, H)
    p["dn_W2"], p["dn_b2"] = linear(H, H)
    p["cu_W1"], p["cu_b1"] = linear(H, H)
    p["cu_W2"], p["cu_b2"] = linear(H, 1)
    p["cd_W1"], p["cd_b1"] = linear(H, H)
    p["cd_W2"], p["cd_b2"] = linear(H, 1)
    p["cell_W1"], p["cell_b1"] = linear(F + 2 * H, H)
    p["cell_W2"], p["cell_b2"] = linear(H, O)
    p["cw"] = jax.random.uniform(next(keys), (1, 2), jnp.float32, -1.0, 1.0)
    return p


if __name__ == "__main__":
    # small shapes: N cells, N_up / N_down neighbor cells, E_up / E_down boundaries
    N, Nu, Nd = 8, 12, 10
    Eu, Ed = 24, 20
    F, Fu, Fd = 8, 6, 5        # input_nf, upper_nf, lower_nf
    H, O = 16, 8               # hidden_nf, output_nf (== input_nf for residual)
    D = 3                      # coordinate dimension

    key = jax.random.PRNGKey(0)
    k = iter(jax.random.split(key, 16))

    params = init_params(next(k), F, Fu, Fd, H, O)

    h = jax.random.normal(next(k), (N, F), jnp.float32)
    h_up = jax.random.normal(next(k), (Nu, Fu), jnp.float32)
    h_down = jax.random.normal(next(k), (Nd, Fd), jnp.float32)
    x = jax.random.normal(next(k), (N, D), jnp.float32)
    x_up = jax.random.normal(next(k), (Nu, D), jnp.float32)
    x_down = jax.random.normal(next(k), (Nd, D), jnp.float32)

    b_up_i = jax.random.randint(next(k), (Eu,), 0, N, jnp.int32)
    b_up_j = jax.random.randint(next(k), (Eu,), 0, Nu, jnp.int32)
    b_down_i = jax.random.randint(next(k), (Ed,), 0, N, jnp.int32)
    b_down_j = jax.random.randint(next(k), (Ed,), 0, Nd, jnp.int32)

    b_up = (b_up_i, b_up_j)
    b_down = (b_down_j, b_down_i)   # PyTorch forward unpacks as (b_down_j, b_down_i)

    h_out, x_out = ehon_mpl_boundary_forward(
        params, h, h_up, h_down, x, x_up, x_down, b_up, b_down)
    jax.block_until_ready((h_out, x_out))

    h_ref, x_ref = reference_forward(
        params, h, h_up, h_down, x, x_up, x_down, b_up, b_down)

    # The whole kernel path is f32 (exact f32 coordinate differences); the
    # tolerance only absorbs MXU pass precision and summation-order effects.
    np.testing.assert_allclose(np.asarray(h_out), np.asarray(h_ref),
                               rtol=1e-2, atol=1e-2)
    np.testing.assert_allclose(np.asarray(x_out), np.asarray(x_ref),
                               rtol=1e-2, atol=1e-2)
    print("KERNEL_OK")
</pallas_src>

<mosaic_0001>
module attributes {stable_mosaic.version = 11 : i64} {
  func.func @_edge_kernel(%arg0: i32, %arg1: i32, %arg2: memref<2xi32, #tpu.memory_space<smem>>, %arg3: memref<1x128x256xf32, #tpu.memory_space<vmem>>, %arg4: memref<1x1x128xi32, #tpu.memory_space<vmem>>, %arg5: memref<1x128x16xf32, #tpu.memory_space<vmem>>, %arg6: memref<1x1x16xf32, #tpu.memory_space<vmem>>, %arg7: memref<1x1x16xf32, #tpu.memory_space<vmem>>, %arg8: memref<1x16x128xf32, #tpu.memory_space<vmem>>, %arg9: memref<1x1x128xf32, #tpu.memory_space<vmem>>, %arg10: memref<1x128x16xf32, #tpu.memory_space<vmem>>, %arg11: memref<1x1x16xf32, #tpu.memory_space<vmem>>, %arg12: memref<1x16x1xf32, #tpu.memory_space<vmem>>, %arg13: memref<1x1x1xf32, #tpu.memory_space<vmem>>, %arg14: memref<8x256xf32, #tpu.memory_space<vmem>>) attributes {dimension_semantics = [#tpu.dimension_semantics<parallel>, #tpu.dimension_semantics<arbitrary>], iteration_bounds = array<i64: 2, 1>, scalar_prefetch = 1 : i64, scratch_operands = 0 : i64, tpu.core_type = #tpu.core_type<tc>, window_params = [{transform_indices = @transform_0, window_bounds = array<i64: 1, 128, 256>}, {transform_indices = @transform_1, window_bounds = array<i64: 1, 1, 128>}, {transform_indices = @transform_2, window_bounds = array<i64: 1, 128, 16>}, {transform_indices = @transform_3, window_bounds = array<i64: 1, 1, 16>}, {transform_indices = @transform_4, window_bounds = array<i64: 1, 1, 16>}, {transform_indices = @transform_5, window_bounds = array<i64: 1, 16, 128>}, {transform_indices = @transform_6, window_bounds = array<i64: 1, 1, 128>}, {transform_indices = @transform_7, window_bounds = array<i64: 1, 128, 16>}, {transform_indices = @transform_8, window_bounds = array<i64: 1, 1, 16>}, {transform_indices = @transform_9, window_bounds = array<i64: 1, 16, 1>}, {transform_indices = @transform_10, window_bounds = array<i64: 1, 1, 1>}, {transform_indices = @transform_11, window_bounds = array<i64: 8, 256>}]} {
    %c0_i32 = arith.constant 0 : i32
    %0 = arith.cmpi eq, %arg1, %c0_i32 : i32
    %1 = arith.extui %0 : i1 to i32
    %c0_i32_0 = arith.constant 0 : i32
    %2 = arith.cmpi ne, %1, %c0_i32_0 : i32
    scf.if %2 {
      %cst = arith.constant 0.000000e+00 : f32
      %9 = vector.broadcast %cst : f32 to vector<8x256xf32>
      %c0 = arith.constant 0 : index
      %c0_2 = arith.constant 0 : index
      %10 = vector.load %arg14[%c0, %c0_2] : memref<8x256xf32, #tpu.memory_space<vmem>>, vector<8x256xf32>
      tpu.vector_store %arg14[%c0, %c0_2], %9 {strides = array<i32>} : memref<8x256xf32, #tpu.memory_space<vmem>>, vector<8x256xf32>,
    } else {
    }
    %c128_i32 = arith.constant 128 : i32
    %3 = arith.muli %arg1, %c128_i32 : i32
    %4 = arith.index_cast %arg0 : i32 to index
    %5 = memref.load %arg2[%4] : memref<2xi32, #tpu.memory_space<smem>>
    %6 = arith.cmpi slt, %3, %5 : i32
    %7 = arith.extui %6 : i1 to i32
    %c0_i32_1 = arith.constant 0 : i32
    %8 = arith.cmpi ne, %7, %c0_i32_1 : i32
    scf.if %8 {
      %c0 = arith.constant 0 : index
      %c0_2 = arith.constant 0 : index
      %c0_3 = arith.constant 0 : index
      %9 = vector.load %arg3[%c0, %c0_2, %c0_3] : memref<1x128x256xf32, #tpu.memory_space<vmem>>, vector<1x128x256xf32>
      %10 = vector.shape_cast %9 : vector<1x128x256xf32> to vector<128x256xf32>
      %11 = vector.extract_strided_slice %10 {offsets = [0, 0], sizes = [128, 128], strides = [1, 1]} : vector<128x256xf32> to vector<128x128xf32>
      %12 = vector.extract_strided_slice %10 {offsets = [0, 128], sizes = [128, 128], strides = [1, 1]} : vector<128x256xf32> to vector<128x128xf32>
      %13 = arith.mulf %12, %12 : vector<128x128xf32>
      %cst = arith.constant dense<0.000000e+00> : vector<128xf32>
      %14 = vector.multi_reduction <add>, %13, %cst [1] : vector<128x128xf32> to vector<128xf32>
      %15 = vector.shape_cast %14 : vector<128xf32> to vector<128x1xf32>
      %c0_4 = arith.constant 0 : index
      %c0_5 = arith.constant 0 : index
      %c0_6 = arith.constant 0 : index
      %16 = vector.load %arg5[%c0_4, %c0_5, %c0_6] : memref<1x128x16xf32, #tpu.memory_space<vmem>>, vector<1x128x16xf32>
      %17 = vector.shape_cast %16 : vector<1x128x16xf32> to vector<128x16xf32>
      %cst_7 = arith.constant dense<0.000000e+00> : vector<128x16xf32>
      %18 = tpu.matmul %11, %17, %cst_7 {dimension_numbers = #tpu.dot_dimension_numbers<[1], [0], [0], [1], [0, 0, 1, 1], [], []>} : vector<128x128xf32>, vector<128x16xf32>, vector<128x16xf32> -> vector<128x16xf32>
      %c0_8 = arith.constant 0 : index
      %c0_9 = arith.constant 0 : index
      %c0_10 = arith.constant 0 : index
      %19 = vector.load %arg6[%c0_8, %c0_9, %c0_10] : memref<1x1x16xf32, #tpu.memory_space<vmem>>, vector<1x1x16xf32>
      %20 = vector.shape_cast %19 : vector<1x1x16xf32> to vector<1x16xf32>
      %21 = vector.broadcast %15 : vector<128x1xf32> to vector<128x16xf32>
      %22 = vector.broadcast %20 : vector<1x16xf32> to vector<128x16xf32>
      %23 = arith.mulf %21, %22 : vector<128x16xf32>
      %24 = arith.addf %18, %23 : vector<128x16xf32>
      %c0_11 = arith.constant 0 : index
      %c0_12 = arith.constant 0 : index
      %c0_13 = arith.constant 0 : index
      %25 = vector.load %arg7[%c0_11, %c0_12, %c0_13] : memref<1x1x16xf32, #tpu.memory_space<vmem>>, vector<1x1x16xf32>
      %26 = vector.shape_cast %25 : vector<1x1x16xf32> to vector<1x16xf32>
      %27 = vector.broadcast %26 : vector<1x16xf32> to vector<128x16xf32>
      %28 = arith.addf %24, %27 : vector<128x16xf32>
      %cst_14 = arith.constant 0.000000e+00 : f32
      %29 = vector.broadcast %cst_14 : f32 to vector<128x16xf32>
      %30 = arith.maximumf %28, %29 : vector<128x16xf32>
      %c0_15 = arith.constant 0 : index
      %c0_16 = arith.constant 0 : index
      %c0_17 = arith.constant 0 : index
      %31 = vector.load %arg8[%c0_15, %c0_16, %c0_17] : memref<1x16x128xf32, #tpu.memory_space<vmem>>, vector<1x16x128xf32>
      %32 = vector.shape_cast %31 : vector<1x16x128xf32> to vector<16x128xf32>
      %cst_18 = arith.constant dense<0.000000e+00> : vector<128x128xf32>
      %33 = tpu.matmul %30, %32, %cst_18 {dimension_numbers = #tpu.dot_dimension_numbers<[1], [0], [0], [1], [0, 0, 1, 1], [], []>} : vector<128x16xf32>, vector<16x128xf32>, vector<128x128xf32> -> vector<128x128xf32>
      %c0_19 = arith.constant 0 : index
      %c0_20 = arith.constant 0 : index
      %c0_21 = arith.constant 0 : index
      %34 = vector.load %arg9[%c0_19, %c0_20, %c0_21] : memref<1x1x128xf32, #tpu.memory_space<vmem>>, vector<1x1x128xf32>
      %35 = vector.shape_cast %34 : vector<1x1x128xf32> to vector<1x128xf32>
      %36 = vector.broadcast %35 : vector<1x128xf32> to vector<128x128xf32>
      %37 = arith.addf %33, %36 : vector<128x128xf32>
      %c0_22 = arith.constant 0 : index
      %c0_23 = arith.constant 0 : index
      %c0_24 = arith.constant 0 : index
      %38 = vector.load %arg10[%c0_22, %c0_23, %c0_24] : memref<1x128x16xf32, #tpu.memory_space<vmem>>, vector<1x128x16xf32>
      %39 = vector.shape_cast %38 : vector<1x128x16xf32> to vector<128x16xf32>
      %cst_25 = arith.constant dense<0.000000e+00> : vector<128x16xf32>
      %40 = tpu.matmul %37, %39, %cst_25 {dimension_numbers = #tpu.dot_dimension_numbers<[1], [0], [0], [1], [0, 0, 1, 1], [], []>} : vector<128x128xf32>, vector<128x16xf32>, vector<128x16xf32> -> vector<128x16xf32>
      %c0_26 = arith.constant 0 : index
      %c0_27 = arith.constant 0 : index
      %c0_28 = arith.constant 0 : index
      %41 = vector.load %arg11[%c0_26, %c0_27, %c0_28] : memref<1x1x16xf32, #tpu.memory_space<vmem>>, vector<1x1x16xf32>
      %42 = vector.shape_cast %41 : vector<1x1x16xf32> to vector<1x16xf32>
      %43 = vector.broadcast %42 : vector<1x16xf32> to vector<128x16xf32>
      %44 = arith.addf %40, %43 : vector<128x16xf32>
      %cst_29 = arith.constant 0.000000e+00 : f32
      %45 = vector.broadcast %cst_29 : f32 to vector<128x16xf32>
      %46 = arith.maximumf %44, %45 : vector<128x16xf32>
      %c0_30 = arith.constant 0 : index
      %c0_31 = arith.constant 0 : index
      %c0_32 = arith.constant 0 : index
      %47 = vector.load %arg12[%c0_30, %c0_31, %c0_32] : memref<1x16x1xf32, #tpu.memory_space<vmem>>, vector<1x16x1xf32>
      %48 = vector.shape_cast %47 : vector<1x16x1xf32> to vector<16x1xf32>
      %cst_33 = arith.constant dense<0.000000e+00> : vector<128x1xf32>
      %49 = tpu.matmul %46, %48, %cst_33 {dimension_numbers = #tpu.dot_dimension_numbers<[1], [0], [0], [1], [0, 0, 1, 1], [], []>} : vector<128x16xf32>, vector<16x1xf32>, vector<128x1xf32> -> vector<128x1xf32>
      %c0_34 = arith.constant 0 : index
      %c0_35 = arith.constant 0 : index
      %c0_36 = arith.constant 0 : index
      %50 = vector.load %arg13[%c0_34, %c0_35, %c0_36] : memref<1x1x1xf32, #tpu.memory_space<vmem>>, vector<1x1x1xf32>
      %51 = vector.shape_cast %50 : vector<1x1x1xf32> to vector<1x1xf32>
      %52 = vector.broadcast %51 : vector<1x1xf32> to vector<128x1xf32>
      %53 = arith.addf %49, %52 : vector<128x1xf32>
      %54 = arith.negf %53 : vector<128x1xf32>
      %55 = math.exp %54 : vector<128x1xf32>
      %cst_37 = arith.constant 1.000000e+00 : f32
      %56 = vector.broadcast %cst_37 : f32 to vector<128x1xf32>
      %57 = arith.addf %56, %55 : vector<128x1xf32>
      %58 = arith.divf %56, %57 : vector<128x1xf32>
      %59 = vector.broadcast %58 : vector<128x1xf32> to vector<128x128xf32>
      %60 = arith.mulf %12, %59 : vector<128x128xf32>
      %61 = tpu.iota {dimensions = array<i32: 0>} : vector<8x128xi32>
      %c0_38 = arith.constant 0 : index
      %c0_39 = arith.constant 0 : index
      %c0_40 = arith.constant 0 : index
      %62 = vector.load %arg4[%c0_38, %c0_39, %c0_40] : memref<1x1x128xi32, #tpu.memory_space<vmem>>, vector<1x1x128xi32>
      %63 = vector.shape_cast %62 : vector<1x1x128xi32> to vector<1x128xi32>
      %64 = vector.broadcast %63 : vector<1x128xi32> to vector<8x128xi32>
      %65 = arith.cmpi eq, %61, %64 : vector<8x128xi32>
      %66 = arith.extui %65 : vector<8x128xi1> to vector<8x128xi32>
      %67 = arith.sitofp %66 : vector<8x128xi32> to vector<8x128xf32>
      %68 = tpu.concatenate %37, %60 in 1 : vector<128x128xf32>, vector<128x128xf32> -> vector<128x256xf32>
      %c0_41 = arith.constant 0 : index
      %c0_42 = arith.constant 0 : index
      %69 = vector.load %arg14[%c0_41, %c0_42] : memref<8x256xf32, #tpu.memory_space<vmem>>, vector<8x256xf32>
      %cst_43 = arith.constant dense<0.000000e+00> : vector<8x256xf32>
      %70 = tpu.matmul %67, %68, %cst_43 {dimension_numbers = #tpu.dot_dimension_numbers<[1], [0], [0], [1], [0, 0, 1, 1], [], []>} : vector<8x128xf32>, vector<128x256xf32>, vector<8x256xf32> -> vector<8x256xf32>
      %71 = arith.addf %69, %70 : vector<8x256xf32>
      %c0_44 = arith.constant 0 : index
      %c0_45 = arith.constant 0 : index
      %72 = vector.load %arg14[%c0_44, %c0_45] : memref<8x256xf32, #tpu.memory_space<vmem>>, vector<8x256xf32>
      tpu.vector_store %arg14[%c0_44, %c0_45], %71 {strides = array<i32>} : memref<8x256xf32, #tpu.memory_space<vmem>>, vector<8x256xf32>,
    } else {
    }
    return
  }
  func.func @transform_0(%arg0: i32, %arg1: i32, %arg2: memref<2xi32, #tpu.memory_space<smem>>) -> (i32, i32, i32) {
    %c0_i32 = arith.constant 0 : i32
    %c0_i32_0 = arith.constant 0 : i32
    return %arg0, %arg1, %c0_i32 : i32, i32, i32
  }
  func.func @transform_1(%arg0: i32, %arg1: i32, %arg2: memref<2xi32, #tpu.memory_space<smem>>) -> (i32, i32, i32) {
    %c0_i32 = arith.constant 0 : i32
    %c0_i32_0 = arith.constant 0 : i32
    return %arg0, %c0_i32, %arg1 : i32, i32, i32
  }
  func.func @transform_2(%arg0: i32, %arg1: i32, %arg2: memref<2xi32, #tpu.memory_space<smem>>) -> (i32, i32, i32) {
    %c0_i32 = arith.constant 0 : i32
    %c0_i32_0 = arith.constant 0 : i32
    %c0_i32_1 = arith.constant 0 : i32
    return %arg0, %c0_i32, %c0_i32_0 : i32, i32, i32
  }
  func.func @transform_3(%arg0: i32, %arg1: i32, %arg2: memref<2xi32, #tpu.memory_space<smem>>) -> (i32, i32, i32) {
    %c0_i32 = arith.constant 0 : i32
    %c0_i32_0 = arith.constant 0 : i32
    %c0_i32_1 = arith.constant 0 : i32
    return %arg0, %c0_i32, %c0_i32_0 : i32, i32, i32
  }
  func.func @transform_4(%arg0: i32, %arg1: i32, %arg2: memref<2xi32, #tpu.memory_space<smem>>) -> (i32, i32, i32) {
    %c0_i32 = arith.constant 0 : i32
    %c0_i32_0 = arith.constant 0 : i32
    %c0_i32_1 = arith.constant 0 : i32
    return %arg0, %c0_i32, %c0_i32_0 : i32, i32, i32
  }
  func.func @transform_5(%arg0: i32, %arg1: i32, %arg2: memref<2xi32, #tpu.memory_space<smem>>) -> (i32, i32, i32) {
    %c0_i32 = arith.constant 0 : i32
    %c0_i32_0 = arith.constant 0 : i32
    %c0_i32_1 = arith.constant 0 : i32
    return %arg0, %c0_i32, %c0_i32_0 : i32, i32, i32
  }
  func.func @transform_6(%arg0: i32, %arg1: i32, %arg2: memref<2xi32, #tpu.memory_space<smem>>) -> (i32, i32, i32) {
    %c0_i32 = arith.constant 0 : i32
    %c0_i32_0 = arith.constant 0 : i32
    %c0_i32_1 = arith.constant 0 : i32
    return %arg0, %c0_i32, %c0_i32_0 : i32, i32, i32
  }
  func.func @transform_7(%arg0: i32, %arg1: i32, %arg2: memref<2xi32, #tpu.memory_space<smem>>) -> (i32, i32, i32) {
    %c0_i32 = arith.constant 0 : i32
    %c0_i32_0 = arith.constant 0 : i32
    %c0_i32_1 = arith.constant 0 : i32
    return %arg0, %c0_i32, %c0_i32_0 : i32, i32, i32
  }
  func.func @transform_8(%arg0: i32, %arg1: i32, %arg2: memref<2xi32, #tpu.memory_space<smem>>) -> (i32, i32, i32) {
    %c0_i32 = arith.constant 0 : i32
    %c0_i32_0 = arith.constant 0 : i32
    %c0_i32_1 = arith.constant 0 : i32
    return %arg0, %c0_i32, %c0_i32_0 : i32, i32, i32
  }
  func.func @transform_9(%arg0: i32, %arg1: i32, %arg2: memref<2xi32, #tpu.memory_space<smem>>) -> (i32, i32, i32) {
    %c0_i32 = arith.constant 0 : i32
    %c0_i32_0 = arith.constant 0 : i32
    %c0_i32_1 = arith.constant 0 : i32
    return %arg0, %c0_i32, %c0_i32_0 : i32, i32, i32
  }
  func.func @transform_10(%arg0: i32, %arg1: i32, %arg2: memref<2xi32, #tpu.memory_space<smem>>) -> (i32, i32, i32) {
    %c0_i32 = arith.constant 0 : i32
    %c0_i32_0 = arith.constant 0 : i32
    %c0_i32_1 = arith.constant 0 : i32
    return %arg0, %c0_i32, %c0_i32_0 : i32, i32, i32
  }
  func.func @transform_11(%arg0: i32, %arg1: i32, %arg2: memref<2xi32, #tpu.memory_space<smem>>) -> (i32, i32) {
    %c0_i32 = arith.constant 0 : i32
    %c0_i32_0 = arith.constant 0 : i32
    return %c0_i32, %arg0 : i32, i32
  }
}

</mosaic_0001>

<bundles_post_ra>
// kernel: tpu_custom_call.1
= control target key start
LH: loop header
LB: loop body
LE: loop exit
PB: predicated region body
PF: predicated region fallthrough
CT: control target
= control target key end

     0   :  { %s2554_s21 = smov [#allocation3]   ;;  %s3082_s0 = inlined_call_operand.hbm [shape: s32[2], index: 0, kind: input, shape index: {}]   ;;  %s3083_s1 = inlined_call_operand.vmem [shape: f32[2,128,256], index: 1, kind: input, shape index: {}]   ;;  %s3084_s2 = inlined_call_operand.vmem [shape: s32[2,1,128], index: 2, kind: input, shape index: {}]   ;;  %s3085_s3 = inlined_call_operand.vmem [shape: f32[2,128,16], index: 3, kind: input, shape index: {}]   ;;  %s3086_s4 = inlined_call_operand.vmem [shape: f32[2,1,16], index: 4, kind: input, shape index: {}]   ;;  %s3087_s5 = inlined_call_operand.vmem [shape: f32[2,1,16], index: 5, kind: input, shape index: {}]   ;;  %s3088_s6 = inlined_call_operand.vmem [shape: f32[2,16,128], index: 6, kind: input, shape index: {}]   ;;  %s3089_s7 = inlined_call_operand.vmem [shape: f32[2,1,128], index: 7, kind: input, shape index: {}]   ;;  %s3090_s8 = inlined_call_operand.vmem [shape: f32[2,128,16], index: 8, kind: input, shape index: {}]   ;;  %s3091_s9 = inlined_call_operand.vmem [shape: f32[2,1,16], index: 9, kind: input, shape index: {}]   ;;  %s3092_s10 = inlined_call_operand.vmem [shape: f32[2,16,1], index: 10, kind: input, shape index: {}]   ;;  %s3093_s11 = inlined_call_operand.vmem [shape: f32[2,1,1], index: 11, kind: input, shape index: {}]   ;;  %s3094_s12 = inlined_call_operand.hbm [shape: f32[8,512], index: 12, kind: output, shape index: {}]  }
   0x1   :  { %3108 = sst [smem:[#allocation18_spill]] %s3083_s1 }
   0x2   :  { %3109 = sst [smem:[#allocation19_spill]] %s3085_s3 }
   0x3   :  { %3110 = sst [smem:[#allocation20_spill]] %s3088_s6 }
   0x4   :  { %3111 = sst [smem:[#allocation21_spill]] %s3094_s12 }
   0x5   :  { %18 = dma.hbm_to_smem %s3082_s0, 16, %s2554_s21, [#allocation2] }
   0x6   :  { %2524 = dma.done.wait [#allocation2], 16 }
   0x7   :  { %2525 = vsyncadd [#allocation2], 4294967280 }
   0x8   :  { %20 = sfence }
   0x9   :  { %21 = vsyncpa [#allocation5], 0 }
   0xa   :  { %23 = vsyncpa [#allocation5 + $0x1], 0  ;;  %s2628_s24 = smov 0   ;;  %s2630_s25 = smov 0  }
   0xb   :  { %s2632_s26 = smov 0   ;;  %s2634_s27 = smov 0  }
   0xc   :  { %s2636_s28 = smov 0   ;;  %s2638_s29 = smov 0  }
   0xd LB: > { %3112 = sst [smem:[#allocation8_spill]] %s2532_s24  ;;  %s1976_s0 = sadd.s32 4294967295, %s2552_s29   ;;  %s2552_s29 = sphi %s2638_s29, %s29_s29   ;;  %s2548_s28 = sphi %s2636_s28, %s3142_s28   ;;  %s2544_s27 = sphi %s2634_s27, %s3141_s27   ;;  %s2540_s26 = sphi %s2632_s26, %s3140_s26   ;;  %s2536_s25 = sphi %s2630_s25, %s3139_s25   ;;  %s2532_s24 = sphi %s2628_s24, %s3138_s24  }
   0xe   : > { %3113 = sst [smem:[#allocation9_spill]] %s2536_s25  ;;  %s1977_s30 = sadd.s32 4294967294, %s2552_s29  }
   0xf   : > { %3114 = sst [smem:[#allocation10_spill]] %s2540_s26  ;;  %s41_s13 = sadd.s32 1, %s2548_s28 }
  0x10   : > { %3115 = sst [smem:[#allocation11_spill]] %s2544_s27  ;;  %s338_s14 = sadd.s32 1, %s2540_s26 }
  0x11   : > { %3116 = sst [smem:[#allocation12_spill]] %s2548_s28  ;;  %p43_p0 = scmp.ge.s32.totalorder %s41_s13, 2 }
  0x12   : > { %3117 = sst [smem:[#allocation13_spill]] %s2552_s29  ;;  %p348_p1 = scmp.ne.s32.totalorder %s2540_s26, %s2536_s25 }
  0x13   : > { %p349_p2 = scmp.eq.s32.totalorder %s1976_s0, 1  ;;  %p354_p3 = scmp.ne.s32.totalorder %s2536_s25, %s2532_s24 }
  0x14   : > { %s3144_s13 = smov (%p43_p0, %s41_s13), 0  ;;  %p355_p5 = scmp.eq.s32.totalorder %s1977_s30, 1 }
  0x15   : > { %3118 = sst [smem:[#allocation14_spill]] %s3144_s13  ;;  %p2668_p4 = por %p349_p2, %p348_p1 }
  0x16   : > { %s335_s16 = ssub.s32 %s2548_s28, %s3144_s13  ;;  %p1980_p6 = scmp.ge.s32.totalorder %s2552_s29, 1 }
  0x17   : > { %s3119_s15 = scalar_select %p2668_p4, 1, 0 }
  0x18   : > { %p336_p7 = scmp.eq.s32.totalorder %s335_s16, 0  ;;  %p2675_p8 = por %p355_p5, %p354_p3 }
  0x19   : > { %3120 = sst [smem:[#allocation15_spill]] %s3119_s15  ;;  %p458_p9 = scmp.lt.s32.totalorder %s2552_s29, 3 }
  0x1a   : > { %s3121_s17 = scalar_select %p2675_p8, 1, 0 }
  0x1b   : > { %s2681_s18 = scalar_select %p336_p7, %s2540_s26, %s338_s14  }
  0x1c   : > { %3122 = sst [smem:[#allocation16_spill]] %s3121_s17  ;;  %p459_p10 = pnand %p1980_p6, %p458_p9 }
  0x1d   : > { %3123 = sst [smem:[#allocation17_spill]] %s2681_s18  ;;  %s3095_s19 = sand.u32 (!%p459_p10), 1, %s2536_s25  }
  0x1e   : > { %462 = sbr.rel (%p459_p10) target bundleno = 1326 (0x52e), region = 64  ;;  %p545_p11 = scmp.lt.s32.totalorder (!%p459_p10), %s2544_s27, 1 }
  0x1f   : > { %s1981_s20 = sshll.u32 (!%p459_p10), %s3095_s19, 4  ;;  %s604_s21 = sld [smem:[#allocation3 + %s2544_s27]] (!%p459_p10) }
  0x20   : > { %s2691_s23 = scalar_lea.vmem (!%p459_p10), [#allocation4], %s1981_s20  ;;  %s3124_s1 = sld [smem:[#allocation18_spill]] (!%p459_p10) }
  0x21   : > { %s3125_s3 = sld [smem:[#allocation19_spill]] (!%p459_p10) }
  0x22   : > { %s3126_s6 = sld [smem:[#allocation20_spill]] (!%p459_p10) }
  0x23   : > { %s2689_s22 = scalar_select %p545_p11, %s2544_s27, 1  ;;  %v2555_v0 = vmov 0.0  }
  0x24   : > { %601 = vst [vmem:[%s2691_s23] sm:$0xff] %v2555_v0  ;;  %602 = vst [vmem:[%s2691_s23 + $0x8] sm:$0xff] %v2555_v0 }
  0x25   : > { %s2055_s0 = sshll.u32 %s2689_s22, 8  ;;  %s2056_s18 = sshll.u32 %s2689_s22, 7 }
  0x26   : > { %s2703_s28 = scalar_lea.vmem %s3124_s1, %s2055_s0  ;;  %s2057_s14 = sshll.u32 %s2689_s22, 4 }
  0x27   : > { %s2709_s17 = scalar_lea.vmem %s3125_s3, %s2056_s18  ;;  %s579_s26 = scalar_lea.vmem %s3089_s7, %s2689_s22 }
  0x28   : > { %s2723_s13 = scalar_lea.vmem %s3126_s6, %s2057_s14  ;;  %s2732_s3 = scalar_lea.vmem %s3090_s8, %s2056_s18 }
  0x29   : > { %s587_s25 = scalar_lea.vmem %s3091_s9, %s2689_s22  ;;  %s2741_s12 = scalar_lea.vmem %s3092_s10, %s2057_s14 }
  0x2a   : > { %s595_s6 = scalar_lea.vmem %s3093_s11, %s2689_s22  ;;  %p1993_p12 = scmp.le.s32.totalorder %s604_s21, 0 }
  0x2b   : > { %s3127_s18 = scalar_lea.vmem (!%p1993_p12), %s3086_s4, %s2689_s22  ;;  %s3128_s14 = scalar_lea.vmem (!%p1993_p12), %s3087_s5, %s2689_s22 }
  0x2c   : > { %608 = sbr.rel (%p1993_p12) target bundleno = 1301 (0x515), region = 72  ;;  %s3129_s24 = scalar_lea.vmem (!%p1993_p12), %s3084_s2, %s2689_s22 }
  0x31   : > { %v704_v1 = vld [vmem:[%s2709_s17 + $0x78] sm:$0xff]  ;;  %v703_v2 = vld [vmem:[%s2709_s17 + $0x70] sm:$0xff]  ;;  %v702_v3 = vld [vmem:[%s2709_s17 + $0x68] sm:$0xff]  ;;  %vm921_vm0 = vcmask 130048  }
  0x32   : > { %2161 = vmatprep.subr.mxu0 %v704_v1  ;;  %v701_v4 = vld [vmem:[%s2709_s17 + $0x60] sm:$0xff]  ;;  %v700_v6 = vld [vmem:[%s2709_s17 + $0x58] sm:$0xff]  ;;  %v699_v7 = vld [vmem:[%s2709_s17 + $0x50] sm:$0xff] }
  0x33   : > { %2162 = vmatpush3.msra.mxu0 %v704_v1  ;;  %v609_v5 = vld [vmem:[%s2703_s28] sm:$0xff]  ;;  %v698_v8 = vld [vmem:[%s2709_s17 + $0x48] sm:$0xff]  ;;  %v612_v12 = vld [vmem:[%s2703_s28 + $0x18] sm:$0xff] }
  0x34   : > { %2163 = vmatprep.subr.mxu0 %v703_v2  ;;  %2193 = vmatprep.mubr.f32.mxu0 %v609_v5  ;;  %v610_v9 = vld [vmem:[%s2703_s28 + $0x8] sm:$0xff]  ;;  %v616_v13 = vld [vmem:[%s2703_s28 + $0x38] sm:$0xff]  ;;  %v697_v14 = vld [vmem:[%s2709_s17 + $0x40] sm:$0xff]  ;;  %v642_v16 = vmul.f32 %v612_v12, %v612_v12 }
  0x35   : > { %2164 = vmatpush3.msra.mxu0 %v703_v2  ;;  %v641_v10 = vmul.f32 %v610_v9, %v610_v9  ;;  %v614_v11 = vld [vmem:[%s2703_s28 + $0x28] sm:$0xff]  ;;  %v696_v17 = vld [vmem:[%s2709_s17 + $0x38] sm:$0xff]  ;;  %v644_v18 = vmul.f32 %v616_v13, %v616_v13  ;;  %v695_v21 = vld [vmem:[%s2709_s17 + $0x30] sm:$0xff] }
  0x36   : > { %2165 = vmatprep.subr.mxu0 %v702_v3  ;;  %v643_v15 = vmul.f32 %v614_v11, %v614_v11  ;;  %v618_v19 = vld [vmem:[%s2703_s28 + $0x48] sm:$0xff]  ;;  %v620_v20 = vld [vmem:[%s2703_s28 + $0x58] sm:$0xff]  ;;  %v693_v27 = vld [vmem:[%s2709_s17 + $0x20] sm:$0xff] }
  0x37   : > { %2166 = vmatpush3.msra.mxu0 %v702_v3  ;;  %657 = vadd.xlane.f32.xlu0 %v641_v10  ;;  %v645_v22 = vmul.f32 %v618_v19, %v618_v19  ;;  %v694_v23 = vld [vmem:[%s2709_s17 + $0x28] sm:$0xff]  ;;  %v646_v24 = vmul.f32 %v620_v20, %v620_v20  ;;  %v624_v26 = vld [vmem:[%s2703_s28 + $0x78] sm:$0xff]  ;;  %v691_v33 = vld [vmem:[%s2709_s17 + $0x10] sm:$0xff] }
  0x38   : > { %2167 = vmatprep.subr.mxu0 %v701_v4  ;;  %661 = vadd.xlane.f32.xlu1 %v643_v15  ;;  %v622_v25 = vld [vmem:[%s2703_s28 + $0x68] sm:$0xff]  ;;  %v692_v29 = vld [vmem:[%s2709_s17 + $0x18] sm:$0xff]  ;;  %v648_v30 = vmul.f32 %v624_v26, %v624_v26  ;;  %v689_v39 = vld [vmem:[%s2709_s17] sm:$0xff] }
  0x39   : > { %2168 = vmatpush3.msra.mxu0 %v701_v4  ;;  %v647_v28 = vmul.f32 %v622_v25, %v622_v25  ;;  %v626_v31 = vld [vmem:[%s2703_s28 + $0x88] sm:$0xff]  ;;  %v628_v32 = vld [vmem:[%s2703_s28 + $0x98] sm:$0xff]  ;;  %v611_v41 = vld [vmem:[%s2703_s28 + $0x10] sm:$0xff] }
  0x3a   : > { %2169 = vmatprep.subr.mxu0 %v700_v6  ;;  %v649_v34 = vmul.f32 %v626_v31, %v626_v31  ;;  %v690_v35 = vld [vmem:[%s2709_s17 + $0x8] sm:$0xff]  ;;  %v650_v36 = vmul.f32 %v628_v32, %v628_v32  ;;  %v2775_v38 = vld [vmem:[%s2703_s28 + $0xb8] sm:$0xff]  ;;  %v613_v44 = vld [vmem:[%s2703_s28 + $0x20] sm:$0xff] }
  0x3b   : > { %2170 = vmatpush3.msra.mxu0 %v700_v6  ;;  %659 = vadd.xlane.f32.xlu0 %v642_v16  ;;  %v630_v37 = vld [vmem:[%s2703_s28 + $0xa8] sm:$0xff]  ;;  %v652_v42 = vmul.f32 %v2775_v38, %v2775_v38  ;;  %v2786_v45 = vld [vmem:[%s2703_s28 + $0xd8] sm:$0xff]  ;;  %v615_v47 = vld [vmem:[%s2703_s28 + $0x30] sm:$0xff] }
  0x3c   : > { %2171 = vmatprep.subr.mxu0 %v699_v7  ;;  %663 = vadd.xlane.f32.xlu1 %v644_v18  ;;  %v651_v40 = vmul.f32 %v630_v37, %v630_v37  ;;  %v2782_v43 = vld [vmem:[%s2703_s28 + $0xc8] sm:$0xff]  ;;  %v654_v48 = vmul.f32 %v2786_v45, %v2786_v45  ;;  %v617_v50 = vld [vmem:[%s2703_s28 + $0x40] sm:$0xff]  ;;  %v2798_v51 = vld [vmem:[%s2703_s28 + $0xf8] sm:$0xff] }
  0x3d   : > { %2172 = vmatpush3.msra.mxu0 %v699_v7  ;;  %v653_v46 = vmul.f32 %v2782_v43, %v2782_v43  ;;  %v2794_v49 = vld [vmem:[%s2703_s28 + $0xe8] sm:$0xff]  ;;  %v619_v53 = vld [vmem:[%s2703_s28 + $0x50] sm:$0xff]  ;;  %v656_v54 = vmul.f32 %v2798_v51, %v2798_v51  ;;  %v621_v55 = vld [vmem:[%s2703_s28 + $0x60] sm:$0xff] }
  0x3e   : > { %2173 = vmatprep.subr.mxu0 %v698_v8  ;;  %v655_v52 = vmul.f32 %v2794_v49, %v2794_v49  ;;  %v623_v56 = vld [vmem:[%s2703_s28 + $0x70] sm:$0xff]  ;;  %v625_v57 = vld [vmem:[%s2703_s28 + $0x80] sm:$0xff]  ;;  %v913_v1 = vld [vmem:[%s2723_s13 + $0x8] sm:$0xff] }
  0x3f   : > { %2174 = vmatpush3.msra.mxu0 %v698_v8  ;;  %665 = vadd.xlane.f32.xlu0 %v645_v22  ;;  %v627_v58 = vld [vmem:[%s2703_s28 + $0x90] sm:$0xff]  ;;  %v629_v59 = vld [vmem:[%s2703_s28 + $0xa0] sm:$0xff]  ;;  %v1130_v3 = vld [vmem:[%s2732_s3 + $0x78] sm:$0xff] }
  0x40   : > { %2175 = vmatprep.subr.mxu0 %v697_v14  ;;  %667 = vadd.xlane.f32.xlu1 %v646_v24  ;;  %v631_v60 = vld [vmem:[%s2703_s28 + $0xb0] sm:$0xff]  ;;  %v633_v61 = vld [vmem:[%s2703_s28 + $0xc0] sm:$0xff] }
  0x41   : > { %2176 = vmatpush3.msra.mxu0 %v697_v14  ;;  %v635_v62 = vld [vmem:[%s2703_s28 + $0xd0] sm:$0xff]  ;;  %v637_v63 = vld [vmem:[%s2703_s28 + $0xe0] sm:$0xff]  ;;  %2217 = vmatprep.subr.mxu1 %v913_v1 }
  0x42   : > { %2177 = vmatprep.subr.mxu0 %v696_v17  ;;  %v639_v0 = vld [vmem:[%s2703_s28 + $0xf0] sm:$0xff]  ;;  %2218 = vmatpush3.msra.mxu1 %v913_v1  ;;  %v912_v2 = vld [vmem:[%s2723_s13] sm:$0xff] }
  0x43   : > { %2178 = vmatpush3.msra.mxu0 %v696_v17  ;;  %669 = vadd.xlane.f32.xlu0 %v647_v28  ;;  %v2823_v9 = vld [vmem:[%s3127_s18] ss:$0 sm:$0xff] }
  0x44   : > { %2179 = vmatprep.subr.mxu0 %v695_v21  ;;  %671 = vadd.xlane.f32.xlu1 %v648_v30  ;;  %v2832_v17 = vld [vmem:[%s3128_s14] ss:$0 sm:$0xff] }
  0x45   : > { %2180 = vmatpush3.msra.mxu0 %v695_v21  ;;  %2219 = vmatprep.subr.mxu1 %v912_v2 }
  0x46   : > { %2181 = vmatprep.subr.mxu0 %v694_v23  ;;  %2220 = vmatpush3.msra.mxu1 %v912_v2 }
  0x47   : > { %2182 = vmatpush3.msra.mxu0 %v694_v23  ;;  %673 = vadd.xlane.f32.xlu0 %v649_v34 }
  0x48   : > { %2183 = vmatprep.subr.mxu0 %v693_v27  ;;  %675 = vadd.xlane.f32.xlu1 %v650_v36 }
  0x49   : > { %2184 = vmatpush3.msra.mxu0 %v693_v27  ;;  %2245 = vmatprep.subr.mxu1 %v1130_v3 }
  0x4a   : > { %2185 = vmatprep.subr.mxu0 %v692_v29 }
  0x4b   : > { %2186 = vmatpush3.msra.mxu0 %v692_v29  ;;  %677 = vadd.xlane.f32.xlu0 %v651_v40  ;;  %v1129_v40 = vld [vmem:[%s2732_s3 + $0x70] sm:$0xff] }
  0x4c   : > { %2187 = vmatprep.subr.mxu0 %v691_v33  ;;  %679 = vadd.xlane.f32.xlu1 %v652_v42 }
  0x4d   : > { %2188 = vmatpush3.msra.mxu0 %v691_v33 }
  0x4e   : > { %2189 = vmatprep.subr.mxu0 %v690_v35 }
  0x4f   : > { %2190 = vmatpush3.msra.mxu0 %v690_v35  ;;  %681 = vadd.xlane.f32.xlu0 %v653_v46 }
  0x50   : > { %2191 = vmatprep.subr.mxu0 %v689_v39  ;;  %683 = vadd.xlane.f32.xlu1 %v654_v48  ;;  %v1128_v48 = vld [vmem:[%s2732_s3 + $0x68] sm:$0xff] }
  0x51   : > { %2192 = vmatpush3.msra.mxu0 %v689_v39 }
  0x52   : > { %2194 = vmatmul.mubr.f32.vlgmr.msra.gmra.mxu0 %v611_v41 }
  0x53   : > { %2196 = vmatprep.mubr.f32.mxu0 %v613_v44  ;;  %685 = vadd.xlane.f32.xlu0 %v655_v52 }
  0x54   : > { %687 = vadd.xlane.f32.xlu1 %v656_v54 }
  0x56   : > { %2197 = vmatmul.mubr.f32.gmra.mxu0 %v615_v47 }
  0x57   : > { %2199 = vmatprep.mubr.f32.mxu0 %v617_v50 }
  0x5a   : > { %2200 = vmatmul.mubr.f32.gmra.mxu0 %v619_v53 }
  0x5b   : > { %2202 = vmatprep.mubr.f32.mxu0 %v621_v55 }
  0x5e   : > { %2203 = vmatmul.mubr.f32.gmra.mxu0 %v623_v56 }
  0x5f   : > { %2205 = vmatprep.mubr.f32.mxu0 %v625_v57 }
  0x62   : > { %2206 = vmatmul.mubr.f32.gmra.mxu0 %v627_v58  ;;  %v1127_v58 = vld [vmem:[%s2732_s3 + $0x60] sm:$0xff] }
  0x63   : > { %2208 = vmatprep.mubr.f32.mxu0 %v629_v59 }
  0x66   : > { %2209 = vmatmul.mubr.f32.gmra.mxu0 %v631_v60 }
  0x67   : > { %2211 = vmatprep.mubr.f32.mxu0 %v633_v61 }
  0x6a   : > { %2212 = vmatmul.mubr.f32.gmra.mxu0 %v635_v62 }
  0x6b   : > { %2214 = vmatprep.mubr.f32.mxu0 %v637_v63  ;;  %v1126_v63 = vld [vmem:[%s2732_s3 + $0x58] sm:$0xff] }
  0x6e   : > { %2215 = vmatmul.mubr.f32.gmra.mxu0 %v639_v0 }
  0xc0   : > { %v658_v5 = vpop.xlane.xlu0 %657 }
  0xc1   : > { %v662_v4 = vpop.xlane.xlu1 %661  ;;  %v712_v15 = vmul.f32 %v2823_v9, %v658_v5 }
  0xc2   : > { %v714_v23 = vmul.f32 %v2823_v9, %v662_v4 }
  0xc4   : > { %v660_v7 = vpop.xlane.xlu0 %659 }
  0xc5   : > { %v664_v6 = vpop.xlane.xlu1 %663  ;;  %v713_v11 = vmul.f32 %v2823_v9, %v660_v7  ;;  %v1125_v7 = vld [vmem:[%s2732_s3 + $0x50] sm:$0xff] }
  0xc6   : > { %v715_v18 = vmul.f32 %v2823_v9, %v664_v6 }
  0xc8   : > { %v666_v8 = vpop.xlane.xlu0 %665 }
  0xc9   : > { %v668_v10 = vpop.xlane.xlu1 %667  ;;  %v716_v31 = vmul.f32 %v2823_v9, %v666_v8 }
  0xca   : > { %v717_v25 = vmul.f32 %v2823_v9, %v668_v10 }
  0xcc   : > { %v670_v12 = vpop.xlane.xlu0 %669 }
  0xcd   : > { %v672_v14 = vpop.xlane.xlu1 %671  ;;  %v718_v46 = vmul.f32 %v2823_v9, %v670_v12 }
  0xce   : > { %v719_v39 = vmul.f32 %v2823_v9, %v672_v14  ;;  %v1124_v14 = vld [vmem:[%s2732_s3 + $0x48] sm:$0xff] }
  0xd0   : > { %v674_v27 = vpop.xlane.xlu0 %673 }
  0xd1   : > { %v676_v29 = vpop.xlane.xlu1 %675  ;;  %v720_v62 = vmul.f32 %v2823_v9, %v674_v27 }
  0xd2   : > { %v721_v57 = vmul.f32 %v2823_v9, %v676_v29 }
  0xd4   : > { %v678_v47 = vpop.xlane.xlu0 %677 }
  0xd5   : > { %v680_v54 = vpop.xlane.xlu1 %679 }
  0xd6   : > { %v723_v5 = vmul.f32 %v2823_v9, %v680_v54 }
  0xd8   : > { %v682_v6 = vpop.xlane.xlu0 %681 }
  0xd9   : > { %v684_v10 = vpop.xlane.xlu1 %683  ;;  %v724_v27 = vmul.f32 %v2823_v9, %v682_v6 }
 0x112   : > { %v2195_v13 = vpop.f32.mrf.mxu0 }
 0x113   : > { %v800_v16 = vadd.f32 %v2195_v13, %v713_v11  ;;  %v722_v13 = vmul.f32 %v2823_v9, %v678_v47 }
 0x114   : > { %v794_v19 = vpop.f32.mrf.mxu0 }
 0x115   : > { %v795_v20 = vadd.f32 %v794_v19, %v712_v15  ;;  %v881_v21 = vadd.f32 %v2832_v17, %v800_v16 }
 0x116   : > { %v2198_v22 = vpop.f32.mrf.mxu0 }
 0x117   : > { %v810_v24 = vadd.f32 %v2198_v22, %v715_v18  ;;  %v880_v26 = vadd.f32 %v2832_v17, %v795_v20  ;;  %v897_v33 = vmax.f32 %v881_v21, 0.0  ;;  %v725_v21 = vmul.f32 %v2823_v9, %v684_v10  ;;  %v1123_v22 = vld [vmem:[%s2732_s3 + $0x40] sm:$0xff] }
 0x118   : > { %v804_v28 = vpop.f32.mrf.mxu0 }
 0x119   : > { %v805_v30 = vadd.f32 %v804_v28, %v714_v23  ;;  %v896_v32 = vmax.f32 %v880_v26, 0.0  ;;  %v883_v34 = vadd.f32 %v2832_v17, %v810_v24  ;;  %v688_v24 = vpop.xlane.xlu1 %687  ;;  %v1122_v28 = vld [vmem:[%s2732_s3 + $0x38] sm:$0xff] }
 0x11a   : > { %v2201_v35 = vpop.f32.mrf.mxu0 }
 0x11b   : > { %v882_v36 = vadd.f32 %v2832_v17, %v805_v30  ;;  %v820_v37 = vadd.f32 %v2201_v35, %v717_v25  ;;  %2221 = vmatprep.mubr.msk.f32.mxu1 %vm921_vm0, %v896_v32  ;;  %v899_v50 = vmax.f32 %v883_v34, 0.0  ;;  %v686_v32 = vpop.xlane.xlu0 %685  ;;  %v727_v35 = vmul.f32 %v2823_v9, %v688_v24 }
 0x11c   : > { %v814_v41 = vpop.f32.mrf.mxu0  ;;  %2222 = vmatmul.mubr.msk.f32.vlgmr.msra.gmra.mxu1 %vm921_vm0, %v897_v33 }
 0x11d   : > { %v898_v42 = vmax.f32 %v882_v36, 0.0  ;;  %v815_v44 = vadd.f32 %v814_v41, %v716_v31  ;;  %2246 = vmatpush3.msra.mxu1 %v1130_v3  ;;  %v885_v52 = vadd.f32 %v2832_v17, %v820_v37  ;;  %v1121_v36 = vld [vmem:[%s2732_s3 + $0x30] sm:$0xff]  ;;  %v726_v41 = vmul.f32 %v2823_v9, %v686_v32 }
 0x11e   : > { %v2204_v53 = vpop.f32.mrf.mxu0  ;;  %2247 = vmatprep.subr.mxu1 %v1129_v40 }
 0x11f   : > { %v884_v55 = vadd.f32 %v2832_v17, %v815_v44  ;;  %v830_v56 = vadd.f32 %v2204_v53, %v719_v39  ;;  %2224 = vmatprep.mubr.msk.f32.mxu1 %vm921_vm0, %v898_v42  ;;  %2248 = vmatpush3.msra.mxu1 %v1129_v40  ;;  %v901_v0 = vmax.f32 %v885_v52, 0.0  ;;  %v1120_v42 = vld [vmem:[%s2732_s3 + $0x28] sm:$0xff]  ;;  %v1119_v52 = vld [vmem:[%s2732_s3 + $0x20] sm:$0xff] }
 0x120   : > { %v824_v59 = vpop.f32.mrf.mxu0  ;;  %2225 = vmatmul.mubr.msk.f32.gmra.mxu1 %vm921_vm0, %v899_v50  ;;  %2249 = vmatprep.subr.mxu1 %v1128_v48 }
 0x121   : > { %v900_v60 = vmax.f32 %v884_v55, 0.0  ;;  %v825_v61 = vadd.f32 %v824_v59, %v718_v46  ;;  %2250 = vmatpush3.msra.mxu1 %v1128_v48  ;;  %v887_v1 = vadd.f32 %v2832_v17, %v830_v56  ;;  %v1118_v56 = vld [vmem:[%s2732_s3 + $0x18] sm:$0xff] }
 0x122   : > { %v2207_v2 = vpop.f32.mrf.mxu0  ;;  %2251 = vmatprep.subr.mxu1 %v1127_v58 }
 0x123   : > { %v886_v3 = vadd.f32 %v2832_v17, %v825_v61  ;;  %v840_v4 = vadd.f32 %v2207_v2, %v721_v57  ;;  %2227 = vmatprep.mubr.msk.f32.mxu1 %vm921_vm0, %v900_v60  ;;  %2252 = vmatpush3.msra.mxu1 %v1127_v58  ;;  %v903_v15 = vmax.f32 %v887_v1, 0.0  ;;  %v1117_v61 = vld [vmem:[%s2732_s3 + $0x10] sm:$0xff]  ;;  %v1996_v2 = vld [vmem:[%s579_s26] ss:$0 sm:$0xff] }
 0x124   : > { %v834_v8 = vpop.f32.mrf.mxu0  ;;  %2228 = vmatmul.mubr.msk.f32.gmra.mxu1 %vm921_vm0, %v901_v0  ;;  %2253 = vmatprep.subr.mxu1 %v1126_v63  ;;  %v1299_v0 = vld [vmem:[%s2741_s12] sm:$0xff] }
 0x125   : > { %v902_v11 = vmax.f32 %v886_v3, 0.0  ;;  %v835_v12 = vadd.f32 %v834_v8, %v720_v62  ;;  %2254 = vmatpush3.msra.mxu1 %v1126_v63  ;;  %v889_v16 = vadd.f32 %v2832_v17, %v840_v4  ;;  %v1115_v62 = vld [vmem:[%s2732_s3] sm:$0xff]  ;;  %v1300_v63 = vld [vmem:[%s2741_s12 + $0x8] sm:$0xff] }
 0x126   : > { %v2210_v18 = vpop.f32.mrf.mxu0  ;;  %2255 = vmatprep.subr.mxu1 %v1125_v7  ;;  %2301 = vmatprep.subr.mxu0 %v1300_v63 }
 0x127   : > { %v888_v19 = vadd.f32 %v2832_v17, %v835_v12  ;;  %v850_v20 = vadd.f32 %v2210_v18, %v723_v5  ;;  %2230 = vmatprep.mubr.msk.f32.mxu1 %vm921_vm0, %v902_v11  ;;  %2256 = vmatpush3.msra.mxu1 %v1125_v7  ;;  %v905_v29 = vmax.f32 %v889_v16, 0.0 }
 0x128   : > { %v844_v23 = vpop.f32.mrf.mxu0  ;;  %2231 = vmatmul.mubr.msk.f32.gmra.mxu1 %vm921_vm0, %v903_v15  ;;  %2257 = vmatprep.subr.mxu1 %v1124_v14 }
 0x129   : > { %v904_v25 = vmax.f32 %v888_v19, 0.0  ;;  %v845_v26 = vadd.f32 %v844_v23, %v722_v13  ;;  %2258 = vmatpush3.msra.mxu1 %v1124_v14  ;;  %v891_v30 = vadd.f32 %v2832_v17, %v850_v20  ;;  %2302 = vmatpush3.msra.mxu0 %v1300_v63 }
 0x12a   : > { %v2213_v31 = vpop.f32.mrf.mxu0  ;;  %2259 = vmatprep.subr.mxu1 %v1123_v22  ;;  %2303 = vmatprep.subr.mxu0 %v1299_v0 }
 0x12b   : > { %v890_v33 = vadd.f32 %v2832_v17, %v845_v26  ;;  %v860_v34 = vadd.f32 %v2213_v31, %v725_v21  ;;  %2233 = vmatprep.mubr.msk.f32.mxu1 %vm921_vm0, %v904_v25  ;;  %2260 = vmatpush3.msra.mxu1 %v1123_v22  ;;  %v907_v44 = vmax.f32 %v891_v30, 0.0 }
 0x12c   : > { %v854_v37 = vpop.f32.mrf.mxu0  ;;  %2234 = vmatmul.mubr.msk.f32.gmra.mxu1 %vm921_vm0, %v905_v29  ;;  %2261 = vmatprep.subr.mxu1 %v1122_v28 }
 0x12d   : > { %v906_v39 = vmax.f32 %v890_v33, 0.0  ;;  %v855_v40 = vadd.f32 %v854_v37, %v724_v27  ;;  %2262 = vmatpush3.msra.mxu1 %v1122_v28  ;;  %v893_v46 = vadd.f32 %v2832_v17, %v860_v34  ;;  %2304 = vmatpush3.msra.mxu0 %v1299_v0 }
 0x12e   : > { %v2216_v47 = vpop.f32.mrf.mxu0  ;;  %2263 = vmatprep.subr.mxu1 %v1121_v36 }
 0x12f   : > { %v892_v48 = vadd.f32 %v2832_v17, %v855_v40  ;;  %v870_v50 = vadd.f32 %v2216_v47, %v727_v35  ;;  %2236 = vmatprep.mubr.msk.f32.mxu1 %vm921_vm0, %v906_v39  ;;  %2264 = vmatpush3.msra.mxu1 %v1121_v36  ;;  %v909_v57 = vmax.f32 %v893_v46, 0.0  ;;  %v2013_v36 = vld [vmem:[%s587_s25] ss:$0 sm:$0xff] }
 0x130   : > { %v864_v53 = vpop.f32.mrf.mxu0  ;;  %2237 = vmatmul.mubr.msk.f32.gmra.mxu1 %vm921_vm0, %v907_v44  ;;  %2265 = vmatprep.subr.mxu1 %v1120_v42 }
 0x131   : > { %v908_v9 = vmax.f32 %v892_v48, 0.0  ;;  %v895_v54 = vadd.f32 %v2832_v17, %v870_v50  ;;  %v865_v55 = vadd.f32 %v864_v53, %v726_v41  ;;  %2266 = vmatpush3.msra.mxu1 %v1120_v42 }
 0x132   : > { %2267 = vmatprep.subr.mxu1 %v1119_v52 }
 0x133   : > { %v894_v58 = vadd.f32 %v2832_v17, %v865_v55  ;;  %2239 = vmatprep.mubr.msk.f32.mxu1 %vm921_vm0, %v908_v9  ;;  %2268 = vmatpush3.msra.mxu1 %v1119_v52  ;;  %v911_v59 = vmax.f32 %v895_v54, 0.0  ;;  %v1116_v17 = vld [vmem:[%s2732_s3 + $0x8] sm:$0xff] }
 0x134   : > { %2240 = vmatmul.mubr.msk.f32.gmra.mxu1 %vm921_vm0, %v909_v57  ;;  %2269 = vmatprep.subr.mxu1 %v1118_v56 }
 0x135   : > { %v910_v60 = vmax.f32 %v894_v58, 0.0  ;;  %2270 = vmatpush3.msra.mxu1 %v1118_v56 }
 0x136   : > { %2271 = vmatprep.subr.mxu1 %v1117_v61 }
 0x137   : > { %2242 = vmatprep.mubr.msk.f32.mxu1 %vm921_vm0, %v910_v60  ;;  %2272 = vmatpush3.msra.mxu1 %v1117_v61 }
 0x138   : > { %2243 = vmatmul.mubr.msk.f32.gmra.mxu1 %vm921_vm0, %v911_v59  ;;  %2273 = vmatprep.subr.mxu1 %v1116_v17 }
 0x139   : > { %2274 = vmatpush3.msra.mxu1 %v1116_v17 }
 0x13a   : > { %2275 = vmatprep.subr.mxu1 %v1115_v62 }
 0x13b   : > { %2276 = vmatpush3.msra.mxu1 %v1115_v62 }
 0x1dc   : > { %v2223_v1 = vpop.f32.mrf.mxu1 }
 0x1dd   : > { %v2904_v5 = vadd.f32 %v2223_v1, %v1996_v2 }
 0x1de   : > { %v1036_v3 = vpop.f32.mrf.mxu1 }
 0x1df   : > { %v2902_v4 = vadd.f32 %v1996_v2, %v1036_v3 }
 0x1e0   : > { %v2226_v6 = vpop.f32.mrf.mxu1 }
 0x1e1   : > { %2277 = vmatprep.mubr.f32.mxu1 %v2902_v4  ;;  %v2910_v10 = vadd.f32 %v2226_v6, %v1996_v2 }
 0x1e2   : > { %v1046_v7 = vpop.f32.mrf.mxu1  ;;  %2278 = vmatmul.mubr.f32.vlgmr.msra.gmra.mxu1 %v2904_v5 }
 0x1e3   : > { %v2908_v8 = vadd.f32 %v1996_v2, %v1046_v7 }
 0x1e4   : > { %v2229_v11 = vpop.f32.mrf.mxu1 }
 0x1e5   : > { %2280 = vmatprep.mubr.f32.mxu1 %v2908_v8  ;;  %v2916_v14 = vadd.f32 %v2229_v11, %v1996_v2 }
 0x1e6   : > { %v1056_v12 = vpop.f32.mrf.mxu1  ;;  %2281 = vmatmul.mubr.f32.gmra.mxu1 %v2910_v10 }
 0x1e7   : > { %v2914_v13 = vadd.f32 %v1996_v2, %v1056_v12 }
 0x1e8   : > { %v2232_v15 = vpop.f32.mrf.mxu1 }
 0x1e9   : > { %2283 = vmatprep.mubr.f32.mxu1 %v2914_v13  ;;  %v2922_v19 = vadd.f32 %v2232_v15, %v1996_v2 }
 0x1ea   : > { %v1066_v16 = vpop.f32.mrf.mxu1  ;;  %2284 = vmatmul.mubr.f32.gmra.mxu1 %v2916_v14 }
 0x1eb   : > { %v2920_v18 = vadd.f32 %v1996_v2, %v1066_v16 }
 0x1ec   : > { %v2235_v20 = vpop.f32.mrf.mxu1 }
 0x1ed   : > { %2286 = vmatprep.mubr.f32.mxu1 %v2920_v18  ;;  %v2928_v23 = vadd.f32 %v2235_v20, %v1996_v2 }
 0x1ee   : > { %v1076_v21 = vpop.f32.mrf.mxu1  ;;  %2287 = vmatmul.mubr.f32.gmra.mxu1 %v2922_v19 }
 0x1ef   : > { %v2926_v22 = vadd.f32 %v1996_v2, %v1076_v21 }
 0x1f0   : > { %v2238_v24 = vpop.f32.mrf.mxu1 }
 0x1f1   : > { %2289 = vmatprep.mubr.f32.mxu1 %v2926_v22  ;;  %v2934_v27 = vadd.f32 %v2238_v24, %v1996_v2 }
 0x1f2   : > { %v1086_v25 = vpop.f32.mrf.mxu1  ;;  %2290 = vmatmul.mubr.f32.gmra.mxu1 %v2928_v23 }
 0x1f3   : > { %v2932_v26 = vadd.f32 %v1996_v2, %v1086_v25 }
 0x1f4   : > { %v2241_v28 = vpop.f32.mrf.mxu1 }
 0x1f5   : > { %2292 = vmatprep.mubr.f32.mxu1 %v2932_v26  ;;  %v2940_v31 = vadd.f32 %v2241_v28, %v1996_v2 }
 0x1f6   : > { %v1096_v29 = vpop.f32.mrf.mxu1  ;;  %2293 = vmatmul.mubr.f32.gmra.mxu1 %v2934_v27 }
 0x1f7   : > { %v2938_v30 = vadd.f32 %v1996_v2, %v1096_v29 }
 0x1f8   : > { %v2244_v32 = vpop.f32.mrf.mxu1 }
 0x1f9   : > { %2295 = vmatprep.mubr.f32.mxu1 %v2938_v30  ;;  %v2943_v33 = vadd.f32 %v2244_v32, %v1996_v2 }
 0x1fa   : > { %v1106_v34 = vpop.f32.mrf.mxu1  ;;  %2296 = vmatmul.mubr.f32.gmra.mxu1 %v2940_v31 }
 0x1fb   : > { %v2946_v35 = vadd.f32 %v1996_v2, %v1106_v34 }
 0x1fd   : > { %2298 = vmatprep.mubr.f32.mxu1 %v2946_v35 }
 0x1fe   : > { %2299 = vmatmul.mubr.f32.gmra.mxu1 %v2943_v33 }
 0x2a2   : > { %v2279_v37 = vpop.f32.mrf.mxu1 }
 0x2a3   : > { %v1210_v39 = vadd.f32 %v2279_v37, %v2013_v36 }
 0x2a4   : > { %v1204_v40 = vpop.f32.mrf.mxu1 }
 0x2a5   : > { %v1205_v41 = vadd.f32 %v2013_v36, %v1204_v40  ;;  %v1284_v46 = vmax.f32 %v1210_v39, 0.0 }
 0x2a6   : > { %v2282_v42 = vpop.f32.mrf.mxu1 }
 0x2a7   : > { %v1283_v44 = vmax.f32 %v1205_v41, 0.0  ;;  %v1220_v47 = vadd.f32 %v2282_v42, %v2013_v36 }
 0x2a8   : > { %v1214_v48 = vpop.f32.mrf.mxu1 }
 0x2a9   : > { %v1215_v50 = vadd.f32 %v2013_v36, %v1214_v48  ;;  %2305 = vmatprep.mubr.msk.f32.mxu0 %vm921_vm0, %v1283_v44  ;;  %v1286_v9 = vmax.f32 %v1220_v47, 0.0 }
 0x2aa   : > { %v2285_v52 = vpop.f32.mrf.mxu1  ;;  %2306 = vmatmul.mubr.msk.f32.vlgmr.msra.gmra.mxu0 %vm921_vm0, %v1284_v46  ;;  %v2556_v46 = vmov 0  }
 0x2ab   : > { %v1285_v53 = vmax.f32 %v1215_v50, 0.0  ;;  %v1230_v54 = vadd.f32 %v2285_v52, %v2013_v36  ;;  %2390 = vset.pattern.permute.xlu1 %v2556_v46  ;;  %2389 = vset.pattern.permute.xlu0 %v2556_v46 }
 0x2ac   : > { %v1224_v55 = vpop.f32.mrf.mxu1 }
 0x2ad   : > { %v1225_v56 = vadd.f32 %v2013_v36, %v1224_v55  ;;  %2308 = vmatprep.mubr.msk.f32.mxu0 %vm921_vm0, %v1285_v53  ;;  %v1288_v59 = vmax.f32 %v1230_v54, 0.0 }
 0x2ae   : > { %v2288_v57 = vpop.f32.mrf.mxu1  ;;  %2309 = vmatmul.mubr.msk.f32.gmra.mxu0 %vm921_vm0, %v1286_v9 }
 0x2af   : > { %v1287_v58 = vmax.f32 %v1225_v56, 0.0  ;;  %v1240_v60 = vadd.f32 %v2288_v57, %v2013_v36 }
 0x2b0   : > { %v1234_v61 = vpop.f32.mrf.mxu1 }
 0x2b1   : > { %v1235_v17 = vadd.f32 %v2013_v36, %v1234_v61  ;;  %2311 = vmatprep.mubr.msk.f32.mxu0 %vm921_vm0, %v1287_v58  ;;  %v1290_v0 = vmax.f32 %v1240_v60, 0.0  ;;  %v2980_v58 = vld [vmem:[%s595_s6] ss:$0 sm:$0xff] }
 0x2b2   : > { %v2291_v62 = vpop.f32.mrf.mxu1  ;;  %2312 = vmatmul.mubr.msk.f32.gmra.mxu0 %vm921_vm0, %v1288_v59 }
 0x2b3   : > { %v1289_v63 = vmax.f32 %v1235_v17, 0.0  ;;  %v1250_v1 = vadd.f32 %v2291_v62, %v2013_v36 }
 0x2b4   : > { %v1244_v2 = vpop.f32.mrf.mxu1 }
 0x2b5   : > { %v1245_v3 = vadd.f32 %v2013_v36, %v1244_v2  ;;  %2314 = vmatprep.mubr.msk.f32.mxu0 %vm921_vm0, %v1289_v63  ;;  %v1292_v11 = vmax.f32 %v1250_v1, 0.0 }
 0x2b6   : > { %v2294_v6 = vpop.f32.mrf.mxu1  ;;  %2315 = vmatmul.mubr.msk.f32.gmra.mxu0 %vm921_vm0, %v1290_v0 }
 0x2b7   : > { %v1291_v7 = vmax.f32 %v1245_v3, 0.0  ;;  %v1260_v12 = vadd.f32 %v2294_v6, %v2013_v36 }
 0x2b8   : > { %v1254_v15 = vpop.f32.mrf.mxu1 }
 0x2b9   : > { %v1255_v16 = vadd.f32 %v2013_v36, %v1254_v15  ;;  %2317 = vmatprep.mubr.msk.f32.mxu0 %vm921_vm0, %v1291_v7  ;;  %v1294_v24 = vmax.f32 %v1260_v12, 0.0 }
 0x2ba   : > { %v2297_v20 = vpop.f32.mrf.mxu1  ;;  %2318 = vmatmul.mubr.msk.f32.gmra.mxu0 %vm921_vm0, %v1292_v11 }
 0x2bb   : > { %v1293_v21 = vmax.f32 %v1255_v16, 0.0  ;;  %v1270_v25 = vadd.f32 %v2297_v20, %v2013_v36 }
 0x2bc   : > { %v1264_v28 = vpop.f32.mrf.mxu1 }
 0x2bd   : > { %v1265_v29 = vadd.f32 %v2013_v36, %v1264_v28  ;;  %2320 = vmatprep.mubr.msk.f32.mxu0 %vm921_vm0, %v1293_v21  ;;  %v1296_v37 = vmax.f32 %v1270_v25, 0.0 }
 0x2be   : > { %v2300_v32 = vpop.f32.mrf.mxu1  ;;  %2321 = vmatmul.mubr.msk.f32.gmra.mxu0 %vm921_vm0, %v1294_v24 }
 0x2bf   : > { %v1295_v34 = vmax.f32 %v1265_v29, 0.0  ;;  %v1280_v39 = vadd.f32 %v2300_v32, %v2013_v36 }
 0x2c0   : > { %v1274_v40 = vpop.f32.mrf.mxu1 }
 0x2c1   : > { %v1275_v41 = vadd.f32 %v2013_v36, %v1274_v40  ;;  %2323 = vmatprep.mubr.msk.f32.mxu0 %vm921_vm0, %v1295_v34  ;;  %v1298_v44 = vmax.f32 %v1280_v39, 0.0 }
 0x2c2   : > { %2324 = vmatmul.mubr.msk.f32.gmra.mxu0 %vm921_vm0, %v1296_v37 }
 0x2c3   : > { %v1297_v42 = vmax.f32 %v1275_v41, 0.0 }
 0x2c5   : > { %2326 = vmatprep.mubr.msk.f32.mxu0 %vm921_vm0, %v1297_v42 }
 0x2c6   : > { %2327 = vmatmul.mubr.msk.f32.gmra.mxu0 %vm921_vm0, %v1298_v44 }
 0x36a   : > { %v2971_v47 = vpop.f32.mrf.mxu0 }
 0x36c   : > { %v1422_v48 = vpop.f32.mrf.mxu0 }
 0x36d   : > { %v1423_v29 = vadd.f32 %v2980_v58, %v1422_v48 }
 0x36e   : > { %v2973_v50 = vpop.f32.mrf.mxu0 }
 0x36f   : > { %v2031_v39 = vmul.f32 -1.442695, %v1423_v29 }
 0x370   : > { %v1432_v36 = vpop.f32.mrf.mxu0 }
 0x371   : > { %v1433_v21 = vadd.f32 %v2980_v58, %v1432_v36 }
 0x372   : > { %v2313_v52 = vpop.f32.mrf.mxu0 }
 0x373   : > { %v2033_v32 = vmul.f32 -1.442695, %v1433_v21 }
 0x374   : > { %v1442_v53 = vpop.f32.mrf.mxu0 }
 0x375   : > { %v1443_v6 = vadd.f32 %v2980_v58, %v1442_v53 }
 0x376   : > { %v2316_v9 = vpop.f32.mrf.mxu0 }
 0x377   : > { %v2035_v24 = vmul.f32 -1.442695, %v1443_v6  ;;  %v1458_v46 = vadd.f32 %v2316_v9, %v2980_v58  ;;  %v1438_v9 = vadd.f32 %v2973_v50, %v2980_v58  ;;  %v1428_v6 = vadd.f32 %v2971_v47, %v2980_v58 }
 0x378   : > { %v1452_v54 = vpop.f32.mrf.mxu0 }
 0x379   : > { %v1453_v60 = vadd.f32 %v2980_v58, %v1452_v54 }
 0x37a   : > { %v2319_v55 = vpop.f32.mrf.mxu0 }
 0x37b   : > { %v2037_v0 = vmul.f32 -1.442695, %v1453_v60  ;;  %v1468_v34 = vadd.f32 %v2319_v55, %v2980_v58  ;;  %v2038_v60 = vmul.f32 -1.442695, %v1458_v46 }
 0x37c   : > { %v1462_v56 = vpop.f32.mrf.mxu0 }
 0x37d   : > { %v1463_v40 = vadd.f32 %v2980_v58, %v1462_v56  ;;  %v2040_v41 = vmul.f32 -1.442695, %v1468_v34 }
 0x37e   : > { %v2322_v57 = vpop.f32.mrf.mxu0 }
 0x37f   : > { %v1478_v17 = vadd.f32 %v2322_v57, %v2980_v58  ;;  %v2039_v36 = vmul.f32 -1.442695, %v1463_v40 }
 0x380   : > { %v1472_v59 = vpop.f32.mrf.mxu0 }
 0x381   : > { %v2042_v7 = vmul.f32 -1.442695, %v1478_v17  ;;  %v1473_v25 = vadd.f32 %v2980_v58, %v1472_v59  ;;  %v1448_v59 = vadd.f32 %v2313_v52, %v2980_v58 }
 0x382   : > { %v2325_v61 = vpop.f32.mrf.mxu0 }
 0x383   : > { %v1488_v62 = vadd.f32 %v2325_v61, %v2980_v58  ;;  %v2041_v37 = vmul.f32 -1.442695, %v1473_v25 }
 0x384   : > { %v1482_v63 = vpop.f32.mrf.mxu0 }
 0x385   : > { %v2044_v1 = vmul.f32 -1.442695, %v1488_v62  ;;  %v1483_v2 = vadd.f32 %v2980_v58, %v1482_v63 }
 0x386   : > { %v2328_v3 = vpop.f32.mrf.mxu0 }
 0x387   : > { %v2043_v11 = vmul.f32 -1.442695, %v1483_v2  ;;  %v1498_v12 = vadd.f32 %v2328_v3, %v2980_v58  ;;  %2391 = vpow2.f32 %v2044_v1 }
 0x388   : > { %v1492_v15 = vpop.f32.mrf.mxu0  ;;  %2393 = vpow2.f32 %v2037_v0  ;;  %v2036_v0 = vmul.f32 -1.442695, %v1448_v59 }
 0x389   : > { %v2046_v16 = vmul.f32 -1.442695, %v1498_v12  ;;  %v1493_v20 = vadd.f32 %v2980_v58, %v1492_v15  ;;  %2395 = vpow2.f32 %v2043_v11 }
 0x38a   : > { %2397 = vpow2.f32 %v2042_v7  ;;  %v2034_v7 = vmul.f32 -1.442695, %v1438_v9 }
 0x38b   : > { %2399 = vpow2.f32 %v2046_v16  ;;  %v2045_v28 = vmul.f32 -1.442695, %v1493_v20  ;;  %v2032_v20 = vmul.f32 -1.442695, %v1428_v6 }
 0x38c   : > { %2401 = vpow2.f32 %v2035_v24 }
 0x38d   : > { %2403 = vpow2.f32 %v2045_v28 }
 0x38e   : > { %2405 = vpow2.f32 %v2033_v32 }
 0x38f   : > { %2407 = vpow2.f32 %v2041_v37 }
 0x390   : > { %2409 = vpow2.f32 %v2031_v39 }
 0x391   : > { %2411 = vpow2.f32 %v2040_v41 }
 0x394   : > { %v2392_v42 = vpop.eup %2391 }
 0x395   : > { %v2394_v44 = vpop.eup %2393  ;;  %v1562_v53 = vadd.f32 1.0, %v2392_v42 }
 0x396   : > { %v2396_v48 = vpop.eup %2395  ;;  %v1555_v61 = vadd.f32 1.0, %v2394_v44 }
 0x397   : > { %v2398_v54 = vpop.eup %2397  ;;  %2413 = vrcp.f32 %v1562_v53  ;;  %v1561_v55 = vadd.f32 1.0, %v2396_v48 }
 0x398   : > { %v2400_v57 = vpop.eup %2399  ;;  %2415 = vpow2.f32 %v2039_v36  ;;  %v1560_v62 = vadd.f32 1.0, %v2398_v54 }
 0x399   : > { %v1564_v56 = vadd.f32 1.0, %v2400_v57  ;;  %2417 = vrcp.f32 %v1561_v55  ;;  %v2402_v17 = vpop.eup %2401 }
 0x39a   : > { %v2404_v63 = vpop.eup %2403  ;;  %v1553_v1 = vadd.f32 1.0, %v2402_v17 }
 0x39b   : > { %2419 = vrcp.f32 %v1564_v56  ;;  %v2406_v2 = vpop.eup %2405  ;;  %v1563_v3 = vadd.f32 1.0, %v2404_v63 }
 0x39c   : > { %2421 = vpow2.f32 %v2038_v60  ;;  %v2408_v52 = vpop.eup %2407  ;;  %v1551_v12 = vadd.f32 1.0, %v2406_v2 }
 0x39d   : > { %2423 = vrcp.f32 %v1555_v61  ;;  %v2410_v11 = vpop.eup %2409  ;;  %v1559_v16 = vadd.f32 1.0, %v2408_v52 }
 0x39e   : > { %2425 = vrcp.f32 %v1560_v62  ;;  %v2412_v15 = vpop.eup %2411  ;;  %v1549_v24 = vadd.f32 1.0, %v2410_v11  ;;  %v2557_v62 = vmov 0.0  }
 0x39f   : > { %2427 = vpow2.f32 %v2036_v0  ;;  %v1558_v28 = vadd.f32 1.0, %v2412_v15  ;;  %1769 = vmatprep.mubr.f32.mxu1 %v2557_v62 }
 0x3a0   : > { %2429 = vrcp.f32 %v1553_v1 }
 0x3a1   : > { %2431 = vrcp.f32 %v1563_v3 }
 0x3a2   : > { %2433 = vpow2.f32 %v2034_v7 }
 0x3a3   : > { %2435 = vrcp.f32 %v1551_v12 }
 0x3a4   : > { %v2414_v50 = vpop.eup %2413  ;;  %2437 = vrcp.f32 %v1559_v16 }
 0x3a5   : > { %1664 = vperm.xlu1 %2390, %v2414_v50   ;;  %v2416_v21 = vpop.eup %2415  ;;  %2439 = vpow2.f32 %v2032_v20  ;;  %v2459_v20 = vld [vmem:[%s2703_s28 + $0x68] sm:$0xff] }
 0x3a6   : > { %v2418_v25 = vpop.eup %2417  ;;  %2441 = vrcp.f32 %v1549_v24  ;;  %v1557_v32 = vadd.f32 1.0, %v2416_v21  ;;  %v2460_v24 = vld [vmem:[%s2703_s28 + $0x58] sm:$0xff] }
 0x3a7   : > { %2443 = vrcp.f32 %v1558_v28  ;;  %v2461_v28 = vld [vmem:[%s2703_s28 + $0x48] sm:$0xff] }
 0x3a8   : > { %v2420_v29 = vpop.eup %2419  ;;  %2445 = vrcp.f32 %v1557_v32  ;;  %v2463_v32 = vld [vmem:[%s2703_s28 + $0x28] sm:$0xff] }
 0x3a9   : > { %1674 = vperm.xlu0 %2389, %v2420_v29   ;;  %1659 = vperm.xlu1 %2390, %v2418_v25   ;;  %v2422_v47 = vpop.eup %2421 }
 0x3aa   : > { %v2424_v58 = vpop.eup %2423  ;;  %v1556_v40 = vadd.f32 1.0, %v2422_v47  ;;  %v1693_v47 = vlaneseq }
 0x3ab   : > { %v2426_v34 = vpop.eup %2425 }
 0x3ac   : > { %v2428_v37 = vpop.eup %2427  ;;  %2447 = vrcp.f32 %v1556_v40  ;;  %v2464_v40 = vld [vmem:[%s2703_s28 + $0x18] sm:$0xff] }
 0x3ad   : > { %1654 = vperm.xlu1 %2390, %v2426_v34   ;;  %1629 = vperm.xlu0 %2389, %v2424_v58   ;;  %v2430_v39 = vpop.eup %2429  ;;  %v1554_v46 = vadd.f32 1.0, %v2428_v37  ;;  %v2462_v58 = vld [vmem:[%s2703_s28 + $0x38] sm:$0xff] }
 0x3ae   : > { %v2432_v41 = vpop.eup %2431 }
 0x3af   : > { %v2434_v42 = vpop.eup %2433  ;;  %2449 = vrcp.f32 %v1554_v46 }
 0x3b0   : > { %v2436_v44 = vpop.eup %2435  ;;  %v1552_v54 = vadd.f32 1.0, %v2434_v42 }
 0x3b1   : > { %1669 = vperm.xlu1 %2390, %v2432_v41   ;;  %1619 = vperm.xlu0 %2389, %v2430_v39   ;;  %v2438_v36 = vpop.eup %2437  ;;  %v1694_v39 = vshrl.u32 %v1693_v47, 7  ;;  %v2047_v41 = vld [vmem:[%s3129_s24] ss:$0 sm:$0xff] }
 0x3b2   : > { %v2440_v53 = vpop.eup %2439  ;;  %2451 = vrcp.f32 %v1552_v54 }
 0x3b3   : > { %v2442_v48 = vpop.eup %2441  ;;  %v1550_v57 = vadd.f32 1.0, %v2440_v53  ;;  %vm1700_vm1 = vcmp.eq.s32.totalorder %v1694_v39, %v2047_v41 }
 0x3b4   : > { %v2444_v55 = vpop.eup %2443 }
 0x3b5   : > { %1649 = vperm.xlu1 %2390, %v2438_v36   ;;  %1609 = vperm.xlu0 %2389, %v2436_v44   ;;  %v2446_v59 = vpop.eup %2445  ;;  %2453 = vrcp.f32 %v1550_v57  ;;  %v1703_v44 = vld [vmem:[%s2691_s23] sm:$0xff]  ;;  %v1704_v36 = vld [vmem:[%s2691_s23 + $0x8] sm:$0xff] }
 0x3b9   : > { %1644 = vperm.xlu1 %2390, %v2444_v55   ;;  %1599 = vperm.xlu0 %2389, %v2442_v48   ;;  %v2448_v60 = vpop.eup %2447 }
 0x3bc   : > { %v2450_v56 = vpop.eup %2449 }
 0x3bd   : > { %1639 = vperm.xlu1 %2390, %v2446_v59  }
 0x3bf   : > { %v2452_v61 = vpop.eup %2451 }
 0x3c1   : > { %1634 = vperm.xlu1 %2390, %v2448_v60  }
 0x3c2   : > { %v2454_v17 = vpop.eup %2453 }
 0x3c5   : > { %1624 = vperm.xlu1 %2390, %v2450_v56  }
 0x3c9   : > { %1614 = vperm.xlu1 %2390, %v2452_v61  }
 0x3cd   : > { %1604 = vperm.xlu1 %2390, %v2454_v17  }
 0x420   : > { %v1665_v63 = vpop.permute.xlu1 %1664 }
 0x421   : > { %v1690_v6 = vmul.f32 %v1665_v63, %v2786_v45 }
 0x424   : > { %v1675_v9 = vpop.permute.xlu0 %1674  ;;  %v1660_v0 = vpop.permute.xlu1 %1659 }
 0x425   : > { %v1692_v1 = vmul.f32 %v1675_v9, %v2798_v51  ;;  %v1689_v11 = vmul.f32 %v1660_v0, %v2782_v43 }
 0x427   : > { %1705 = vmatprep.subr.mxu1 %v1692_v1 }
 0x428   : > { %1706 = vmatpush1.msra.mxu1 %v2943_v33  ;;  %v1655_v2 = vpop.permute.xlu1 %1654  ;;  %v1630_v45 = vpop.permute.xlu0 %1629 }
 0x429   : > { %v1688_v51 = vmul.f32 %v1655_v2, %v2775_v38  ;;  %v2457_v38 = vld [vmem:[%s2703_s28 + $0x88] sm:$0xff]  ;;  %v1683_v21 = vmul.f32 %v2459_v20, %v1630_v45 }
 0x42c   : > { %v1670_v3 = vpop.permute.xlu1 %1669 }
 0x42d   : > { %v1691_v52 = vmul.f32 %v1670_v3, %v2794_v49  ;;  %v2455_v49 = vld [vmem:[%s2703_s28 + $0xa8] sm:$0xff] }
 0x42f   : > { %1707 = vmatprep.subr.mxu1 %v1691_v52 }
 0x430   : > { %1708 = vmatpush1.msra.mxu1 %v2946_v35  ;;  %v1650_v7 = vpop.permute.xlu1 %1649  ;;  %v2456_v35 = vld [vmem:[%s2703_s28 + $0x98] sm:$0xff] }
 0x431   : > { %1709 = vmatprep.subr.mxu1 %v1690_v6  ;;  %v1687_v12 = vmul.f32 %v2455_v49, %v1650_v7 }
 0x432   : > { %1710 = vmatpush1.msra.mxu1 %v2940_v31 }
 0x433   : > { %1711 = vmatprep.subr.mxu1 %v1689_v11 }
 0x434   : > { %1712 = vmatpush1.msra.mxu1 %v2938_v30  ;;  %v1645_v33 = vpop.permute.xlu1 %1644  ;;  %v1620_v30 = vpop.permute.xlu0 %1619 }
 0x435   : > { %1713 = vmatprep.subr.mxu1 %v1688_v51  ;;  %v1686_v43 = vmul.f32 %v2456_v35, %v1645_v33  ;;  %v1681_v29 = vmul.f32 %v2461_v28, %v1620_v30 }
 0x436   : > { %1714 = vmatpush1.msra.mxu1 %v2934_v27  ;;  %v2458_v27 = vld [vmem:[%s2703_s28 + $0x78] sm:$0xff] }
 0x437   : > { %1715 = vmatprep.subr.mxu1 %v1687_v12 }
 0x438   : > { %1716 = vmatpush1.msra.mxu1 %v2932_v26  ;;  %v1640_v31 = vpop.permute.xlu1 %1639 }
 0x439   : > { %v1685_v15 = vmul.f32 %v2457_v38, %v1640_v31  ;;  %1717 = vmatprep.subr.mxu1 %v1686_v43 }
 0x43a   : > { %1718 = vmatpush1.msra.mxu1 %v2928_v23  ;;  %v1610_v23 = vpop.permute.xlu0 %1609 }
 0x43b   : > { %1719 = vmatprep.subr.mxu1 %v1685_v15  ;;  %v1679_v34 = vmul.f32 %v2463_v32, %v1610_v23 }
 0x43c   : > { %1720 = vmatpush1.msra.mxu1 %v2926_v22  ;;  %v1635_v16 = vpop.permute.xlu1 %1634 }
 0x43d   : > { %v1684_v50 = vmul.f32 %v2458_v27, %v1635_v16 }
 0x43e   : > { %v1600_v37 = vpop.permute.xlu0 %1599 }
 0x43f   : > { %1721 = vmatprep.subr.mxu1 %v1684_v50 }
 0x440   : > { %1722 = vmatpush1.msra.mxu1 %v2922_v19  ;;  %v1625_v26 = vpop.permute.xlu1 %1624 }
 0x441   : > { %v1682_v25 = vmul.f32 %v2460_v24, %v1625_v26  ;;  %1723 = vmatprep.subr.mxu1 %v1683_v21 }
 0x442   : > { %1724 = vmatpush1.msra.mxu1 %v2920_v18 }
 0x443   : > { %1725 = vmatprep.subr.mxu1 %v1682_v25 }
 0x444   : > { %v1615_v22 = vpop.permute.xlu1 %1614  ;;  %1726 = vmatpush1.msra.mxu1 %v2916_v14 }
 0x445   : > { %v1680_v19 = vmul.f32 %v2462_v58, %v1615_v22  ;;  %1727 = vmatprep.subr.mxu1 %v1681_v29 }
 0x446   : > { %1728 = vmatpush1.msra.mxu1 %v2914_v13  ;;  %v2465_v13 = vld [vmem:[%s2703_s28 + $0x8] sm:$0xff] }
 0x447   : > { %1729 = vmatprep.subr.mxu1 %v1680_v19  ;;  %v1677_v42 = vmul.f32 %v2465_v13, %v1600_v37 }
 0x448   : > { %v1605_v18 = vpop.permute.xlu1 %1604  ;;  %1730 = vmatpush1.msra.mxu1 %v2910_v10  ;;  %v2558_v10 = vmov 1.0  }
 0x449   : > { %v1678_v14 = vmul.f32 %v2464_v40, %v1605_v18  ;;  %1731 = vmatprep.subr.mxu1 %v1679_v34 }
 0x44a   : > { %1732 = vmatpush1.msra.mxu1 %v2908_v8 }
 0x44b   : > { %1733 = vmatprep.subr.mxu1 %v1678_v14 }
 0x44c   : > { %1734 = vmatpush1.msra.mxu1 %v2904_v5 }
 0x44d   : > { %1735 = vmatprep.subr.mxu1 %v1677_v42 }
 0x44e   : > { %1736 = vmatpush1.msra.mxu1 %v2902_v4 }
 0x44f   : > { %2049 = vmatmul.mubr.msk.f32.vlgmr.msra.gmra.mxu1 %vm1700_vm1, %v2558_v10 }
 0x50f   : > { %v1771_v46 = vpop.f32.mrf.mxu1 }
 0x510   : > { %v1776_v53 = vadd.f32 %v1771_v46, %v1703_v44 }
 0x511   : > { %v1773_v48 = vpop.f32.mrf.mxu1 }
 0x512   : > { %1778 = vst [vmem:[%s2691_s23] sm:$0xff] %v1776_v53  ;;  %v1777_v54 = vadd.f32 %v1773_v48, %v1704_v36 }
 0x514   : > { %1779 = vst [vmem:[%s2691_s23 + $0x8] sm:$0xff] %v1777_v54 }
 0x515 PF: > { %s3130_s28 = sld [smem:[#allocation11_spill]]  ;;  %s1795_s17 = sshll.u32 %s2691_s23, 4  ;;  %s1796_s17 = int_to_ptr.vmem [resolvable:$true] %s1795_s17 }
 0x516   : > { %s3131_s22 = sld [smem:[#allocation9_spill]]  ;;  %s2474_s30 = scalar_lea.vmem %s1796_s17, 256 }
 0x517   : > { %s3133_s16 = sld [smem:[#allocation21_spill]]  ;;  %p2475_p13 = scmp.ne.s32.totalorder %s1796_s17, %s2474_s30 }
 0x518   : > { %s2559_s14 = smov [#allocation4]  }
 0x519   : > { %p2476_p0 = pnand %p2475_p13, %p2668_p4  ;;  %s2478_s13 = sshll.u32 %s2559_s14, 4  ;;  %s2479_s13 = int_to_ptr.vmem [resolvable:$false] %s2478_s13 }
 0x51a   : > { %s2480_s19 = scalar_lea.vmem %s2479_s13, 512  ;;  %p2481_p2 = scmp.lt.s32.totalorder %s1796_s17, %s2479_s13 }
 0x51b   : > { %s2060_s25 = sshll.u32 %s3130_s28, 8  ;;  %p2477_p1 = pneg %p2476_p0 }
 0x51c   : > { %s3134_s18 = sand.u32 1, %s3131_s22   ;;  %p2482_p3 = scmp.lt.s32.totalorder %s2480_s19, %s2474_s30 }
 0x51d   : > { %s1793_s1 = scalar_lea.hbm %s3133_s16, %s2060_s25  ;;  %s1781_s21 = scalar_lea.sflag [#allocation5], %s3134_s18 }
 0x51e   : > { %p2483_p5 = por %p2482_p3, %p2481_p2 }
 0x520   : > { %p2484_p6 = pnand %p2483_p5, %p2477_p1 }
 0x522   : > { %2487 = shalt.err (!%p2484_p6)
}
 0x523   : > { %s2488_s3 = scalar_lea.hbm %s1793_s1, 256  ;;  %s2492_s0 = scalar_lea.hbm %s3133_s16, 512 }
 0x524   : > { %p2489_p7 = scmp.ne.s32.totalorder %s1793_s1, %s2488_s3  ;;  %p2493_p11 = scmp.lt.s32.totalorder %s1793_s1, %s3133_s16 }
 0x525   : > { %p2494_p12 = scmp.lt.s32.totalorder %s2492_s0, %s2488_s3 }
 0x526   : > { %p2490_p9 = pnand %p2489_p7, %p2668_p4 }
 0x527   : > { %p2495_p13 = por %p2494_p12, %p2493_p11 }
 0x528   : > { %p2491_p10 = pneg %p2490_p9 }
 0x52a   : > { %p2496_p0 = pnand %p2495_p13, %p2491_p10 }
 0x52c   : > { %2499 = shalt.err (!%p2496_p0)
}
 0x52d   : > { %2329 = dma.vmem_to_hbm [thread:$0]  (%p2668_p4), %s1796_s17, 256, %s1793_s1, %s1781_s21  }
 0x52e PF: > { %s3135_s20 = sld [smem:[#allocation13_spill]] }
 0x52f   : > { %s3136_s24 = sld [smem:[#allocation8_spill]] }
 0x534   : > { %p2335_p1 = scmp.ge.s32.totalorder %s3135_s20, 2 }
 0x535   : > { %s1807_s22 = sand.u32 1, %s3136_s24  }
 0x536   : > { %p2332_p2 = pnand %p2335_p1, %p2675_p8  ;;  %s1808_s25 = scalar_lea.sflag [#allocation5], %s1807_s22 }
 0x538   : > { %p2333_p3 = pneg %p2332_p2 }
 0x53a   : > { %2527 = dma.done.wait (%p2333_p3), %s1808_s25, 256  }
 0x53b   : > { %2529 = vsyncadd (%p2333_p3), %s1808_s25, 4294967040  ;;  %s29_s29 = sadd.s32 1, %s3135_s20   ;;  %s3138_s24 = sld [smem:[#allocation9_spill]] }
 0x53c   : > { %p26_p5 = scmp.ge.s32.totalorder %s29_s29, 4   ;;  %s3139_s25 = sld [smem:[#allocation10_spill]] }
 0x53d   : > { %s3140_s26 = sld [smem:[#allocation17_spill]] }
 0x53e   : > { %s3141_s27 = sld [smem:[#allocation12_spill]]  ;;  %28 = sbr.rel (!%p26_p5) target bundleno = 13 (0xd), region = 137 }
 0x53f   : > { %s3142_s28 = sld [smem:[#allocation14_spill]] }
 0x543   :  { %1813 = vsyncpa [#allocation5], 1 }
 0x544   :  { %1815 = vsyncpa [#allocation5 + $0x1], 1 }

</bundles_post_ra>
